<compile_context>
chip_gen: v5e
topology: v5e:2x2
jax: 0.10.0
libtpu: 0.0.40
codegen_flags: <defaults>
</compile_context>

<pallas_src>
import jax
import jax.numpy as jnp
from jax.experimental import pallas as pl
from jax.experimental.pallas import tpu as pltpu


def _round_up(x: int, m: int) -> int:
    return ((x + m - 1) // m) * m


# ----------------------------------------------------------------------------
# Kernel body: fused 3-layer MLP (Linear->ReLU->Linear->ReLU->Linear->Sigmoid)
# ----------------------------------------------------------------------------
def actor_mlp_kernel(x_ref, w1_ref, b1_ref, w2_ref, b2_ref, w3_ref, b3_ref,
                     o_ref):
    # fc1 + ReLU  (bf16 operands, f32 MXU accumulate; elementwise in f32)
    x = x_ref[...].astype(jnp.bfloat16)            # in-kernel cast (free pack)
    h1 = jnp.dot(x, w1_ref[...], preferred_element_type=jnp.float32)
    h1 = jnp.maximum(h1 + b1_ref[...], 0.0)
    # fc2 + ReLU
    h2 = jnp.dot(h1.astype(jnp.bfloat16), w2_ref[...],
                 preferred_element_type=jnp.float32)
    h2 = jnp.maximum(h2 + b2_ref[...], 0.0)
    # fc3 + Sigmoid (lane-dense padded N). Exact 1/(1+exp(-z)):
    #   z -> -inf : exp(-z) -> +inf -> 1/inf = 0   (correct saturation)
    #   z -> +inf : exp(-z) -> 0    -> 1/1   = 1
    z = jnp.dot(h2.astype(jnp.bfloat16), w3_ref[...],
                preferred_element_type=jnp.float32)
    z = z + b3_ref[...]
    o_ref[...] = 1.0 / (1.0 + jnp.exp(-z))


# ----------------------------------------------------------------------------
# One-time parameter preparation (do NOT call per forward step)
# ----------------------------------------------------------------------------
def prepare_params(params, n_actions):
    """Pad the policy head to a lane-dense width and cast weights to bf16.

    Returns a tuple consumed directly by actor_forward. Call once (or cache
    per optimizer step), not per environment step.
    """
    w1, b1, w2, b2, w3, b3 = params
    F2 = w3.shape[0]
    N_pad = _round_up(max(n_actions, 128), 128)
    w3p = jnp.zeros((F2, N_pad), jnp.float32).at[:, :n_actions].set(w3)
    b3p = jnp.zeros((1, N_pad), jnp.float32).at[:, :n_actions].set(b3)
    return (
        w1.astype(jnp.bfloat16), b1.astype(jnp.float32),
        w2.astype(jnp.bfloat16), b2.astype(jnp.float32),
        w3p.astype(jnp.bfloat16), b3p.astype(jnp.float32),
    )


def _choose_tb(B: int, block_b: int) -> int:
    """128-aligned batch tile; >=2 grid steps for large batches (v7x megacore)."""
    if B <= 128:
        return 128
    tb = _round_up((B + 1) // 2, 128)       # split into at least 2 steps
    return max(128, min(block_b, tb))


# ----------------------------------------------------------------------------
# Forward wrapper: one pallas_call + one column slice
# ----------------------------------------------------------------------------
def actor_forward(x, prepped, n_actions, *, block_b: int = 1024):
    """x: (B, input_dims) f32 -> (B, n_actions) f32 action probabilities."""
    w1b, b1, w2b, b2, w3b, b3p = prepped
    B, D = x.shape
    F1 = w1b.shape[1]
    F2 = w2b.shape[1]
    N_pad = w3b.shape[1]

    TB = _choose_tb(B, block_b)
    grid = (pl.cdiv(B, TB),)                # partial tail block masked by Pallas

    const = lambda i: (0, 0)                # weights resident across grid steps
    out = pl.pallas_call(
        actor_mlp_kernel,
        out_shape=jax.ShapeDtypeStruct((B, N_pad), jnp.float32),
        grid_spec=pltpu.PrefetchScalarGridSpec(
            num_scalar_prefetch=0,
            grid=grid,
            in_specs=[
                pl.BlockSpec((TB, D), lambda i: (i, 0)),   # x tile (f32)
                pl.BlockSpec((D, F1), const),              # w1 (bf16)
                pl.BlockSpec((1, F1), const),              # b1 (f32)
                pl.BlockSpec((F1, F2), const),             # w2 (bf16)
                pl.BlockSpec((1, F2), const),              # b2 (f32)
                pl.BlockSpec((F2, N_pad), const),          # w3 padded (bf16)
                pl.BlockSpec((1, N_pad), const),           # b3 padded (f32)
            ],
            out_specs=pl.BlockSpec((TB, N_pad), lambda i: (i, 0)),
        ),
        compiler_params=pltpu.CompilerParams(
            dimension_semantics=("parallel",)),
    )(x, w1b, b1, w2b, b2, w3b, b3p)

    # strip the lane-padding of the policy head (batch is never padded)
    return out[:, :n_actions]


# ----------------------------------------------------------------------------
# Init + pure-JAX reference
# ----------------------------------------------------------------------------
def init_params(key, input_dims, fc1_dims, fc2_dims, n_actions):
    """PyTorch-style (Kaiming-uniform-ish) init, f32.

    Weights stored as (in_features, out_features): y = x @ W + b.
    """
    ks = jax.random.split(key, 6)

    def linear(kw, kb, fan_in, fan_out):
        bound = 1.0 / jnp.sqrt(fan_in)
        w = jax.random.uniform(kw, (fan_in, fan_out), jnp.float32, -bound, bound)
        b = jax.random.uniform(kb, (1, fan_out), jnp.float32, -bound, bound)
        return w, b

    w1, b1 = linear(ks[0], ks[1], input_dims, fc1_dims)
    w2, b2 = linear(ks[2], ks[3], fc1_dims, fc2_dims)
    w3, b3 = linear(ks[4], ks[5], fc2_dims, n_actions)
    return (w1, b1, w2, b2, w3, b3)


def reference_forward(x, params):
    """Pure-JAX f32 reference (matches the PyTorch forward)."""
    w1, b1, w2, b2, w3, b3 = params
    h = jnp.maximum(x @ w1 + b1, 0.0)
    h = jnp.maximum(h @ w2 + b2, 0.0)
    return jax.nn.sigmoid(h @ w3 + b3)


# TODO(synk): optimizer (Adam), checkpoint save/load and device placement from
# the PyTorch module are host-side training utilities with no kernel equivalent.

if __name__ == "__main__":
    key = jax.random.PRNGKey(0)
    k_x, k_p = jax.random.split(key)

    batch = 8
    input_dims = 32
    fc1_dims = 256
    fc2_dims = 256
    n_actions = 4

    x = jax.random.normal(k_x, (batch, input_dims), jnp.float32)
    params = init_params(k_p, input_dims, fc1_dims, fc2_dims, n_actions)

    # one-time preprocessing (hoisted out of the per-step path)
    prepped = prepare_params(params, n_actions)

    out = actor_forward(x, prepped, n_actions)
    out = jax.block_until_ready(out)
    ref = reference_forward(x, params)

    # sanity: correct shape, strict sigmoid range, close to f32 reference
    assert out.shape == (batch, n_actions)
    assert bool(jnp.all(jnp.isfinite(out)))
    assert bool(jnp.all(out >= 0.0)) and bool(jnp.all(out <= 1.0))
    max_err = float(jnp.max(jnp.abs(out - ref)))
    assert max_err < 5e-2, f"max abs error vs f32 reference: {max_err}"

    print("KERNEL_OK")
</pallas_src>

<mosaic_0001>
module attributes {stable_mosaic.version = 11 : i64} {
  func.func @actor_mlp_kernel(%arg0: i32, %arg1: memref<128x32xf32, #tpu.memory_space<vmem>>, %arg2: memref<32x256xbf16, #tpu.memory_space<vmem>>, %arg3: memref<1x256xf32, #tpu.memory_space<vmem>>, %arg4: memref<256x256xbf16, #tpu.memory_space<vmem>>, %arg5: memref<1x256xf32, #tpu.memory_space<vmem>>, %arg6: memref<256x128xbf16, #tpu.memory_space<vmem>>, %arg7: memref<1x128xf32, #tpu.memory_space<vmem>>, %arg8: memref<128x128xf32, #tpu.memory_space<vmem>>) attributes {dimension_semantics = [#tpu.dimension_semantics<parallel>], iteration_bounds = array<i64: 1>, scalar_prefetch = 0 : i64, scratch_operands = 0 : i64, tpu.core_type = #tpu.core_type<tc>, window_params = [{transform_indices = @transform_0, window_bounds = array<i64: 128, 32>}, {pipeline_mode = #tpu.pipeline_mode<synchronous>, transform_indices = @transform_1, window_bounds = array<i64: 32, 256>}, {pipeline_mode = #tpu.pipeline_mode<synchronous>, transform_indices = @transform_2, window_bounds = array<i64: 1, 256>}, {pipeline_mode = #tpu.pipeline_mode<synchronous>, transform_indices = @transform_3, window_bounds = array<i64: 256, 256>}, {pipeline_mode = #tpu.pipeline_mode<synchronous>, transform_indices = @transform_4, window_bounds = array<i64: 1, 256>}, {pipeline_mode = #tpu.pipeline_mode<synchronous>, transform_indices = @transform_5, window_bounds = array<i64: 256, 128>}, {pipeline_mode = #tpu.pipeline_mode<synchronous>, transform_indices = @transform_6, window_bounds = array<i64: 1, 128>}, {transform_indices = @transform_7, window_bounds = array<i64: 128, 128>}]} {
    %c0 = arith.constant 0 : index
    %c0_0 = arith.constant 0 : index
    %0 = vector.load %arg1[%c0, %c0_0] : memref<128x32xf32, #tpu.memory_space<vmem>>, vector<128x32xf32>
    %1 = arith.truncf %0 : vector<128x32xf32> to vector<128x32xbf16>
    %c0_1 = arith.constant 0 : index
    %c0_2 = arith.constant 0 : index
    %2 = vector.load %arg2[%c0_1, %c0_2] : memref<32x256xbf16, #tpu.memory_space<vmem>>, vector<32x256xbf16>
    %cst = arith.constant dense<0.000000e+00> : vector<128x256xf32>
    %3 = tpu.matmul %1, %2, %cst {dimension_numbers = #tpu.dot_dimension_numbers<[1], [0], [0], [1], [0, 0, 1, 1], [], []>} : vector<128x32xbf16>, vector<32x256xbf16>, vector<128x256xf32> -> vector<128x256xf32>
    %c0_3 = arith.constant 0 : index
    %c0_4 = arith.constant 0 : index
    %4 = vector.load %arg3[%c0_3, %c0_4] : memref<1x256xf32, #tpu.memory_space<vmem>>, vector<1x256xf32>
    %5 = vector.broadcast %4 : vector<1x256xf32> to vector<128x256xf32>
    %6 = arith.addf %3, %5 : vector<128x256xf32>
    %cst_5 = arith.constant 0.000000e+00 : f32
    %7 = vector.broadcast %cst_5 : f32 to vector<128x256xf32>
    %8 = arith.maximumf %6, %7 : vector<128x256xf32>
    %9 = arith.truncf %8 : vector<128x256xf32> to vector<128x256xbf16>
    %c0_6 = arith.constant 0 : index
    %c0_7 = arith.constant 0 : index
    %10 = vector.load %arg4[%c0_6, %c0_7] : memref<256x256xbf16, #tpu.memory_space<vmem>>, vector<256x256xbf16>
    %cst_8 = arith.constant dense<0.000000e+00> : vector<128x256xf32>
    %11 = tpu.matmul %9, %10, %cst_8 {dimension_numbers = #tpu.dot_dimension_numbers<[1], [0], [0], [1], [0, 0, 1, 1], [], []>} : vector<128x256xbf16>, vector<256x256xbf16>, vector<128x256xf32> -> vector<128x256xf32>
    %c0_9 = arith.constant 0 : index
    %c0_10 = arith.constant 0 : index
    %12 = vector.load %arg5[%c0_9, %c0_10] : memref<1x256xf32, #tpu.memory_space<vmem>>, vector<1x256xf32>
    %13 = vector.broadcast %12 : vector<1x256xf32> to vector<128x256xf32>
    %14 = arith.addf %11, %13 : vector<128x256xf32>
    %cst_11 = arith.constant 0.000000e+00 : f32
    %15 = vector.broadcast %cst_11 : f32 to vector<128x256xf32>
    %16 = arith.maximumf %14, %15 : vector<128x256xf32>
    %17 = arith.truncf %16 : vector<128x256xf32> to vector<128x256xbf16>
    %c0_12 = arith.constant 0 : index
    %c0_13 = arith.constant 0 : index
    %18 = vector.load %arg6[%c0_12, %c0_13] : memref<256x128xbf16, #tpu.memory_space<vmem>>, vector<256x128xbf16>
    %cst_14 = arith.constant dense<0.000000e+00> : vector<128x128xf32>
    %19 = tpu.matmul %17, %18, %cst_14 {dimension_numbers = #tpu.dot_dimension_numbers<[1], [0], [0], [1], [0, 0, 1, 1], [], []>} : vector<128x256xbf16>, vector<256x128xbf16>, vector<128x128xf32> -> vector<128x128xf32>
    %c0_15 = arith.constant 0 : index
    %c0_16 = arith.constant 0 : index
    %20 = vector.load %arg7[%c0_15, %c0_16] : memref<1x128xf32, #tpu.memory_space<vmem>>, vector<1x128xf32>
    %21 = vector.broadcast %20 : vector<1x128xf32> to vector<128x128xf32>
    %22 = arith.addf %19, %21 : vector<128x128xf32>
    %cst_17 = arith.constant 0.000000e+00 : f32
    %23 = vector.broadcast %cst_17 : f32 to vector<128x128xf32>
    %24 = arith.subf %23, %22 : vector<128x128xf32>
    %25 = math.exp %24 : vector<128x128xf32>
    %cst_18 = arith.constant 1.000000e+00 : f32
    %26 = vector.broadcast %cst_18 : f32 to vector<128x128xf32>
    %27 = arith.addf %26, %25 : vector<128x128xf32>
    %cst_19 = arith.constant 1.000000e+00 : f32
    %28 = vector.broadcast %cst_19 : f32 to vector<128x128xf32>
    %29 = arith.divf %28, %27 : vector<128x128xf32>
    %c0_20 = arith.constant 0 : index
    %c0_21 = arith.constant 0 : index
    %30 = vector.load %arg8[%c0_20, %c0_21] : memref<128x128xf32, #tpu.memory_space<vmem>>, vector<128x128xf32>
    tpu.vector_store %arg8[%c0_20, %c0_21], %29 {strides = array<i32>} : memref<128x128xf32, #tpu.memory_space<vmem>>, vector<128x128xf32>,
    return
  }
  func.func @transform_0(%arg0: i32) -> (i32, i32) {
    %c0_i32 = arith.constant 0 : i32
    %c0_i32_0 = arith.constant 0 : i32
    return %arg0, %c0_i32 : i32, i32
  }
  func.func @transform_1(%arg0: i32) -> (i32, i32) {
    %c0_i32 = arith.constant 0 : i32
    %c0_i32_0 = arith.constant 0 : i32
    %c0_i32_1 = arith.constant 0 : i32
    return %c0_i32, %c0_i32_0 : i32, i32
  }
  func.func @transform_2(%arg0: i32) -> (i32, i32) {
    %c0_i32 = arith.constant 0 : i32
    %c0_i32_0 = arith.constant 0 : i32
    %c0_i32_1 = arith.constant 0 : i32
    return %c0_i32, %c0_i32_0 : i32, i32
  }
  func.func @transform_3(%arg0: i32) -> (i32, i32) {
    %c0_i32 = arith.constant 0 : i32
    %c0_i32_0 = arith.constant 0 : i32
    %c0_i32_1 = arith.constant 0 : i32
    return %c0_i32, %c0_i32_0 : i32, i32
  }
  func.func @transform_4(%arg0: i32) -> (i32, i32) {
    %c0_i32 = arith.constant 0 : i32
    %c0_i32_0 = arith.constant 0 : i32
    %c0_i32_1 = arith.constant 0 : i32
    return %c0_i32, %c0_i32_0 : i32, i32
  }
  func.func @transform_5(%arg0: i32) -> (i32, i32) {
    %c0_i32 = arith.constant 0 : i32
    %c0_i32_0 = arith.constant 0 : i32
    %c0_i32_1 = arith.constant 0 : i32
    return %c0_i32, %c0_i32_0 : i32, i32
  }
  func.func @transform_6(%arg0: i32) -> (i32, i32) {
    %c0_i32 = arith.constant 0 : i32
    %c0_i32_0 = arith.constant 0 : i32
    %c0_i32_1 = arith.constant 0 : i32
    return %c0_i32, %c0_i32_0 : i32, i32
  }
  func.func @transform_7(%arg0: i32) -> (i32, i32) {
    %c0_i32 = arith.constant 0 : i32
    %c0_i32_0 = arith.constant 0 : i32
    return %arg0, %c0_i32 : i32, i32
  }
}

</mosaic_0001>

<bundles_post_ra>
// kernel: tpu_custom_call.1
= control target key start
LH: loop header
LB: loop body
LE: loop exit
PB: predicated region body
PF: predicated region fallthrough
CT: control target
= control target key end

     0   :  { %12 = vsyncpa [#allocation3], 0  ;;  %s2037_s0 = inlined_call_operand.hbm [shape: f32[8,32], index: 0, kind: input, shape index: {}]   ;;  %s2038_s1 = inlined_call_operand.hbm [shape: bf16[32,256], index: 1, kind: input, shape index: {}]   ;;  %s2039_s2 = inlined_call_operand.hbm [shape: f32[1,256], index: 2, kind: input, shape index: {}]   ;;  %s2040_s3 = inlined_call_operand.hbm [shape: bf16[256,256], index: 3, kind: input, shape index: {}]   ;;  %s2041_s4 = inlined_call_operand.vmem [shape: f32[1,256], index: 4, kind: input, shape index: {}]   ;;  %s2042_s5 = inlined_call_operand.hbm [shape: bf16[256,128], index: 5, kind: input, shape index: {}]   ;;  %s2043_s6 = inlined_call_operand.vmem [shape: f32[1,128], index: 6, kind: input, shape index: {}]   ;;  %s2044_s7 = inlined_call_operand.hbm [shape: f32[8,128], index: 7, kind: output, shape index: {}]  }
   0x1   :  { %13 = vsyncpa [#allocation6], 0 }
   0x2   :  { %14 = vsyncpa [#allocation9], 0 }
   0x3   :  { %15 = vsyncpa [#allocation4], 0 }
   0x4   :  { %19 = vsyncadd [#allocation3], 1920  ;;  %s33_s26 = sshll.u32 %s2038_s1, 4  ;;  %s1845_s27 = smov [#allocation5]   ;;  %s34_s26 = int_to_ptr.hbm [resolvable:$true] %s33_s26 }
   0x5   :  { %s35_s28 = sshll.u32 %s1845_s27, 4  ;;  %s57_s8 = sshll.u32 %s2040_s3, 4  ;;  %s36_s28 = int_to_ptr.vmem [resolvable:$true] %s35_s28  ;;  %s58_s8 = int_to_ptr.hbm [resolvable:$true] %s57_s8 }
   0x6   :  { %s1846_s9 = smov 128   ;;  %s1847_s10 = smov 8  }
   0x7   :  { %41 = dma.hbm_to_vmem [thread:$0]  %s34_s26, 512, %s36_s28, [#allocation6], %s1846_s9, %s1846_s9, %s1847_s10  }
   0x8   :  { %s1848_s11 = smov [#allocation8]   ;;  %s20_s1 = sshll.u32 %s2037_s0, 4  ;;  %s21_s1 = int_to_ptr.hbm [resolvable:$true] %s20_s1 }
   0x9   :  { %s59_s12 = sshll.u32 %s1848_s11, 4  ;;  %s47_s16 = sshll.u32 %s2039_s2, 4  ;;  %s60_s12 = int_to_ptr.vmem [resolvable:$true] %s59_s12  ;;  %s48_s16 = int_to_ptr.hbm [resolvable:$true] %s47_s16 }
   0xa   :  { %65 = dma.hbm_to_vmem [thread:$0]  %s58_s8, 4096, %s60_s12, [#allocation9], %s1846_s9, %s1846_s9, %s1847_s10  }
   0xb   :  { %s1849_s17 = smov [#allocation2]   ;;  %s1850_s19 = smov [#allocation7]  }
   0xc   :  { %s22_s18 = sshll.u32 %s1849_s17, 4  ;;  %s49_s0 = sshll.u32 %s1850_s19, 4  ;;  %s23_s18 = int_to_ptr.vmem [resolvable:$true] %s22_s18  ;;  %s50_s0 = int_to_ptr.vmem [resolvable:$true] %s49_s0 }
   0xd   :  { %28 = dma.hbm_to_vmem [thread:$0]  %s21_s1, 128, %s23_s18, [#allocation3], %s1846_s9, %s1846_s9, %s1847_s10  }
   0xe   :  { %s72_s22 = sshll.u32 %s2042_s5, 4  ;;  %s1851_s23 = smov [#allocation10]   ;;  %s73_s22 = int_to_ptr.hbm [resolvable:$true] %s72_s22 }
   0xf   :  { %52 = dma.hbm_to_vmem [thread:$0]  %s48_s16, 32, %s50_s0, [#allocation6]  }
  0x10   :  { %s74_s24 = sshll.u32 %s1851_s23, 4  ;;  %s1852_s2 = smov 64   ;;  %s75_s24 = int_to_ptr.vmem [resolvable:$true] %s74_s24 }
  0x11   :  { %s1853_s25 = smov 4  }
  0x12   :  { %80 = dma.hbm_to_vmem [thread:$0]  %s73_s22, 2048, %s75_s24, [#allocation9], %s1852_s2, %s1852_s2, %s1853_s25  }
  0x13   :  { %1837 = dma.done.wait [#allocation3], 2048  }
  0x14   :  { %1838 = vsyncadd [#allocation3], 4294965248 }
  0x15   :  { %1839 = dma.done.wait [#allocation6], 544  }
  0x16   :  { %1840 = vsyncadd [#allocation6], 4294966752 }
  0x17   :  { %1841 = dma.done.wait [#allocation9], 6144  }
  0x18   :  { %1842 = vsyncadd [#allocation9], 4294961152  ;;  %v1352_v0 = vld [vmem:[#allocation5 + $0x10] sm:$0xf]  ;;  %v1569_v1 = vld [vmem:[#allocation5 + $0x14] sm:$0xf0] }
  0x19   :  { %v1568_v2 = vld [vmem:[#allocation5 + $0x14] sm:$0xf]  ;;  %v1353_v3 = vor.u32 %v1569_v1, %v1352_v0  ;;  %v1354_v4 = vld [vmem:[#allocation5 + $0x18] sm:$0xf0]  ;;  %v1344_v5 = vld [vmem:[#allocation5] sm:$0xf] }
  0x1a   :  { %v1567_v6 = vld [vmem:[#allocation5 + $0x4] sm:$0xf0]  ;;  %v1357_v7 = vor.u32 %v1568_v2, %v1354_v4  ;;  %v1566_v8 = vld [vmem:[#allocation5 + $0x4] sm:$0xf]  ;;  %v1346_v9 = vld [vmem:[#allocation5 + $0x8] sm:$0xf0] }
  0x1b   :  { %189 = vmatpush.bf16.msra.mxu0 %v1353_v3  ;;  %v1345_v10 = vor.u32 %v1567_v6, %v1344_v5  ;;  %v104_v11 = vld [vmem:[#allocation2] sm:$0xff]  ;;  %v105_v12 = vld [vmem:[#allocation2 + $0x8] sm:$0xff]  ;;  %v1349_v13 = vor.u32 %v1566_v8, %v1346_v9  ;;  %v1584_v14 = vld [vmem:[#allocation8 + $0x74] sm:$0xf]  ;;  %vm158_vm0 = vcmask 261120  }
  0x1c   :  { %238 = vmatpush.bf16.msra.mxu1 %v1357_v7  ;;  %v1434_v15 = vld [vmem:[#allocation8 + $0x78] sm:$0xf0]  ;;  %v1600_v16 = vld [vmem:[#allocation8 + $0xf4] sm:$0xf]  ;;  %v120_v19 = vpack.c.bf16 %v105_v12, %v104_v11  ;;  %v1582_v21 = vld [vmem:[#allocation8 + $0x64] sm:$0xf] }
  0x1d   :  { %v1437_v17 = vor.u32 %v1584_v14, %v1434_v15  ;;  %v1498_v18 = vld [vmem:[#allocation8 + $0xf8] sm:$0xf0]  ;;  %v1426_v22 = vld [vmem:[#allocation8 + $0x68] sm:$0xf0]  ;;  %v1598_v23 = vld [vmem:[#allocation8 + $0xe4] sm:$0xf] }
  0x1e   :  { %v1501_v20 = vor.u32 %v1600_v16, %v1498_v18  ;;  %v1429_v24 = vor.u32 %v1582_v21, %v1426_v22  ;;  %v1490_v25 = vld [vmem:[#allocation8 + $0xe8] sm:$0xf0]  ;;  %v107_v28 = vld [vmem:[#allocation2 + $0x18] sm:$0xff]  ;;  %v108_v36 = vld [vmem:[#allocation2 + $0x20] sm:$0xff] }
  0x1f   :  { %190 = vmatpush.bf16.msra.mxu0 %v1345_v10  ;;  %v1493_v26 = vor.u32 %v1598_v23, %v1490_v25  ;;  %v106_v27 = vld [vmem:[#allocation2 + $0x10] sm:$0xff]  ;;  %v1418_v31 = vld [vmem:[#allocation8 + $0x58] sm:$0xf0]  ;;  %v109_v37 = vld [vmem:[#allocation2 + $0x28] sm:$0xff] }
  0x20   :  { %239 = vmatpush.bf16.msra.mxu1 %v1349_v13  ;;  %v121_v29 = vpack.c.bf16 %v107_v28, %v106_v27  ;;  %v1580_v30 = vld [vmem:[#allocation8 + $0x54] sm:$0xf]  ;;  %v1482_v34 = vld [vmem:[#allocation8 + $0xd8] sm:$0xf0]  ;;  %v122_v38 = vpack.c.bf16 %v109_v37, %v108_v36  ;;  %v1578_v39 = vld [vmem:[#allocation8 + $0x44] sm:$0xf] }
  0x21   :  { %v1596_v32 = vld [vmem:[#allocation8 + $0xd4] sm:$0xf]  ;;  %v1421_v33 = vor.u32 %v1580_v30, %v1418_v31  ;;  %v1410_v40 = vld [vmem:[#allocation8 + $0x48] sm:$0xf0]  ;;  %v1594_v41 = vld [vmem:[#allocation8 + $0xc4] sm:$0xf] }
  0x22   :  { %1358 = vmatmul.msk.bf16.vlgmr.msra.gmra.mxu0 %vm158_vm0, %v120_v19  ;;  %v1485_v35 = vor.u32 %v1596_v32, %v1482_v34  ;;  %v1413_v42 = vor.u32 %v1578_v39, %v1410_v40  ;;  %v1474_v43 = vld [vmem:[#allocation8 + $0xc8] sm:$0xf0]  ;;  %v111_v46 = vld [vmem:[#allocation2 + $0x38] sm:$0xff]  ;;  %v112_v54 = vld [vmem:[#allocation2 + $0x40] sm:$0xff] }
  0x23   :  { %625 = vmatpush.bf16.msrb.mxu0 %v1437_v17  ;;  %1366 = vmatmul.msk.bf16.vlgmr.msra.gmra.mxu1 %vm158_vm0, %v120_v19  ;;  %v1477_v44 = vor.u32 %v1594_v41, %v1474_v43  ;;  %v110_v45 = vld [vmem:[#allocation2 + $0x30] sm:$0xff]  ;;  %v1402_v49 = vld [vmem:[#allocation8 + $0x38] sm:$0xf0]  ;;  %v113_v55 = vld [vmem:[#allocation2 + $0x48] sm:$0xff] }
  0x24   :  { %674 = vmatpush.bf16.msrb.mxu1 %v1501_v20  ;;  %v123_v47 = vpack.c.bf16 %v111_v46, %v110_v45  ;;  %v1576_v48 = vld [vmem:[#allocation8 + $0x34] sm:$0xf]  ;;  %v1466_v52 = vld [vmem:[#allocation8 + $0xb8] sm:$0xf0]  ;;  %v124_v56 = vpack.c.bf16 %v113_v55, %v112_v54  ;;  %v1574_v57 = vld [vmem:[#allocation8 + $0x24] sm:$0xf] }
  0x25   :  { %v1592_v50 = vld [vmem:[#allocation8 + $0xb4] sm:$0xf]  ;;  %v1405_v51 = vor.u32 %v1576_v48, %v1402_v49  ;;  %v1394_v58 = vld [vmem:[#allocation8 + $0x28] sm:$0xf0]  ;;  %v1590_v59 = vld [vmem:[#allocation8 + $0xa4] sm:$0xf] }
  0x26   :  { %v1469_v53 = vor.u32 %v1592_v50, %v1466_v52  ;;  %v1397_v60 = vor.u32 %v1574_v57, %v1394_v58  ;;  %v1458_v61 = vld [vmem:[#allocation8 + $0xa8] sm:$0xf0]  ;;  %v1432_v62 = vld [vmem:[#allocation8 + $0x70] sm:$0xf]  ;;  %v1585_v63 = vld [vmem:[#allocation8 + $0x74] sm:$0xf0] }
  0x27   :  { %626 = vmatpush.bf16.msrb.mxu0 %v1429_v24  ;;  %v1461_v0 = vor.u32 %v1590_v59, %v1458_v61  ;;  %v1433_v1 = vor.u32 %v1585_v63, %v1432_v62  ;;  %v1496_v2 = vld [vmem:[#allocation8 + $0xf0] sm:$0xf]  ;;  %v1601_v3 = vld [vmem:[#allocation8 + $0xf4] sm:$0xf0]  ;;  %v1424_v8 = vld [vmem:[#allocation8 + $0x60] sm:$0xf] }
  0x28   :  { %675 = vmatpush.bf16.msrb.mxu1 %v1493_v26  ;;  %v1497_v4 = vor.u32 %v1601_v3, %v1496_v2  ;;  %v114_v5 = vld [vmem:[#allocation2 + $0x50] sm:$0xff]  ;;  %v115_v6 = vld [vmem:[#allocation2 + $0x58] sm:$0xff]  ;;  %v1583_v9 = vld [vmem:[#allocation8 + $0x64] sm:$0xf0] }
  0x29   :  { %527 = vmatpush.bf16.msra.mxu2 %v1433_v1  ;;  %v125_v7 = vpack.c.bf16 %v115_v6, %v114_v5  ;;  %v1488_v10 = vld [vmem:[#allocation8 + $0xe0] sm:$0xf]  ;;  %v1425_v11 = vor.u32 %v1583_v9, %v1424_v8  ;;  %v1599_v12 = vld [vmem:[#allocation8 + $0xe4] sm:$0xf0]  ;;  %v1572_v14 = vld [vmem:[#allocation8 + $0x14] sm:$0xf] }
  0x2a   :  { %576 = vmatpush.bf16.msra.mxu3 %v1497_v4  ;;  %v1489_v13 = vor.u32 %v1599_v12, %v1488_v10  ;;  %v1386_v15 = vld [vmem:[#allocation8 + $0x18] sm:$0xf0]  ;;  %v1416_v16 = vld [vmem:[#allocation8 + $0x50] sm:$0xf]  ;;  %v1581_v18 = vld [vmem:[#allocation8 + $0x54] sm:$0xf0] }
  0x2b   :  { %627 = vmatpush.bf16.msrb.mxu0 %v1421_v33  ;;  %v1389_v17 = vor.u32 %v1572_v14, %v1386_v15  ;;  %v1480_v19 = vld [vmem:[#allocation8 + $0xd0] sm:$0xf]  ;;  %v1597_v20 = vld [vmem:[#allocation8 + $0xd4] sm:$0xf0]  ;;  %v1417_v21 = vor.u32 %v1581_v18, %v1416_v16  ;;  %v1588_v23 = vld [vmem:[#allocation8 + $0x94] sm:$0xf] }
  0x2c   :  { %676 = vmatpush.bf16.msrb.mxu1 %v1485_v35  ;;  %v1481_v22 = vor.u32 %v1597_v20, %v1480_v19  ;;  %v1450_v24 = vld [vmem:[#allocation8 + $0x98] sm:$0xf0]  ;;  %v1408_v25 = vld [vmem:[#allocation8 + $0x40] sm:$0xf]  ;;  %v1579_v27 = vld [vmem:[#allocation8 + $0x44] sm:$0xf0] }
  0x2d   :  { %528 = vmatpush.bf16.msra.mxu2 %v1425_v11  ;;  %v1453_v26 = vor.u32 %v1588_v23, %v1450_v24  ;;  %v1472_v28 = vld [vmem:[#allocation8 + $0xc0] sm:$0xf]  ;;  %v1409_v30 = vor.u32 %v1579_v27, %v1408_v25  ;;  %v117_v33 = vld [vmem:[#allocation2 + $0x68] sm:$0xff]  ;;  %v1400_v34 = vld [vmem:[#allocation8 + $0x30] sm:$0xf] }
  0x2e   :  { %577 = vmatpush.bf16.msra.mxu3 %v1489_v13  ;;  %v116_v32 = vld [vmem:[#allocation2 + $0x60] sm:$0xff]  ;;  %v1577_v35 = vld [vmem:[#allocation8 + $0x34] sm:$0xf0]  ;;  %v1464_v36 = vld [vmem:[#allocation8 + $0xb0] sm:$0xf] }
  0x2f   :  { %628 = vmatpush.bf16.msrb.mxu0 %v1413_v42  ;;  %v126_v37 = vpack.c.bf16 %v117_v33, %v116_v32  ;;  %v1593_v39 = vld [vmem:[#allocation8 + $0xb4] sm:$0xf0]  ;;  %v1392_v41 = vld [vmem:[#allocation8 + $0x20] sm:$0xf]  ;;  %v1575_v42 = vld [vmem:[#allocation8 + $0x24] sm:$0xf0] }
  0x30   :  { %677 = vmatpush.bf16.msrb.mxu1 %v1477_v44  ;;  %v1465_v40 = vor.u32 %v1593_v39, %v1464_v36  ;;  %v1393_v43 = vor.u32 %v1575_v42, %v1392_v41  ;;  %v1456_v44 = vld [vmem:[#allocation8 + $0xa0] sm:$0xf]  ;;  %v1591_v45 = vld [vmem:[#allocation8 + $0xa4] sm:$0xf0]  ;;  %v1378_v48 = vld [vmem:[#allocation8 + $0x8] sm:$0xf0] }
  0x31   :  { %529 = vmatpush.bf16.msra.mxu2 %v1417_v21  ;;  %v1457_v46 = vor.u32 %v1591_v45, %v1456_v44  ;;  %v1384_v50 = vld [vmem:[#allocation8 + $0x10] sm:$0xf]  ;;  %v1589_v54 = vld [vmem:[#allocation8 + $0x94] sm:$0xf0]  ;;  %v1442_v57 = vld [vmem:[#allocation8 + $0x88] sm:$0xf0] }
  0x32   :  { %1359 = vmatmul.msk.bf16.gmra.mxu0 %vm158_vm0, %v121_v29  ;;  %578 = vmatpush.bf16.msra.mxu3 %v1481_v22  ;;  %v1448_v52 = vld [vmem:[#allocation8 + $0x90] sm:$0xf]  ;;  %v1376_v58 = vld [vmem:[#allocation8] sm:$0xf]  ;;  %v1587_v62 = vld [vmem:[#allocation8 + $0x84] sm:$0xf0] }
  0x33   :  { %1367 = vmatmul.msk.bf16.gmra.mxu1 %vm158_vm0, %v121_v29  ;;  %629 = vmatpush.bf16.msrb.mxu0 %v1405_v51  ;;  %v1595_v29 = vld [vmem:[#allocation8 + $0xc4] sm:$0xf0]  ;;  %v1573_v51 = vld [vmem:[#allocation8 + $0x14] sm:$0xf0]  ;;  %v1449_v55 = vor.u32 %v1589_v54, %v1448_v52  ;;  %v1440_v61 = vld [vmem:[#allocation8 + $0x80] sm:$0xf] }
  0x34   :  { %678 = vmatpush.bf16.msrb.mxu1 %v1469_v53  ;;  %v1473_v31 = vor.u32 %v1595_v29, %v1472_v28  ;;  %v1385_v53 = vor.u32 %v1573_v51, %v1384_v50  ;;  %v118_v63 = vld [vmem:[#allocation2 + $0x70] sm:$0xff]  ;;  %v1441_v2 = vor.u32 %v1587_v62, %v1440_v61  ;;  %v132_v4 = vld [vmem:[#allocation7] sm:$0x3] }
  0x35   :  { %530 = vmatpush.bf16.msra.mxu2 %v1409_v30  ;;  %v1937_v8 = vperm.slane %v132_v4, 1  ;;  %v1609_v9 = vld [vmem:[#allocation10 + $0x38] sm:$0xff]  ;;  %v1608_v25 = vld [vmem:[#allocation10 + $0x30] sm:$0xff]  ;;  %v1607_v41 = vld [vmem:[#allocation10 + $0x28] sm:$0xff] }
  0x36   :  { %579 = vmatpush.bf16.msra.mxu3 %v1473_v31  ;;  %v1617_v10 = vld [vmem:[#allocation10 + $0x78] sm:$0xff]  ;;  %v1615_v42 = vld [vmem:[#allocation10 + $0x68] sm:$0xff] }
  0x37   :  { %630 = vmatpush.bf16.msrb.mxu0 %v1397_v60  ;;  %v1571_v60 = vld [vmem:[#allocation8 + $0x4] sm:$0xf0] }
  0x38   :  { %679 = vmatpush.bf16.msrb.mxu1 %v1461_v0  ;;  %v119_v0 = vld [vmem:[#allocation2 + $0x78] sm:$0xff]  ;;  %v1377_v1 = vor.u32 %v1571_v60, %v1376_v58  ;;  %v1614_v58 = vld [vmem:[#allocation10 + $0x60] sm:$0xff] }
  0x39   :  { %v127_v3 = vpack.c.bf16 %v119_v0, %v118_v63 }
  0x3a   :  { %580 = vmatpush.bf16.msra.mxu3 %v1465_v40 }
  0x3b   :  { %631 = vmatpush.bf16.msrb.mxu0 %v1389_v17 }
  0x3c   :  { %680 = vmatpush.bf16.msrb.mxu1 %v1453_v26  ;;  %v1616_v26 = vld [vmem:[#allocation10 + $0x70] sm:$0xff] }
  0x3e   :  { %581 = vmatpush.bf16.msra.mxu3 %v1457_v46 }
  0x42   :  { %1360 = vmatmul.msk.bf16.gmra.mxu0 %vm158_vm0, %v122_v38  ;;  %582 = vmatpush.bf16.msra.mxu3 %v1449_v55 }
  0x43   :  { %1368 = vmatmul.msk.bf16.gmra.mxu1 %vm158_vm0, %v122_v38  ;;  %v1401_v38 = vor.u32 %v1577_v35, %v1400_v34 }
  0x45   :  { %531 = vmatpush.bf16.msra.mxu2 %v1401_v38 }
  0x46   :  { %583 = vmatpush.bf16.msra.mxu3 %v1441_v2 }
  0x49   :  { %532 = vmatpush.bf16.msra.mxu2 %v1393_v43 }
  0x4a   :  { %952 = vmatpush.bf16.msrb.mxu3 %v1617_v10 }
  0x4d   :  { %533 = vmatpush.bf16.msra.mxu2 %v1385_v53 }
  0x4e   :  { %953 = vmatpush.bf16.msrb.mxu3 %v1616_v26 }
  0x51   :  { %534 = vmatpush.bf16.msra.mxu2 %v1377_v1 }
  0x52   :  { %1361 = vmatmul.msk.bf16.gmra.mxu0 %vm158_vm0, %v123_v47  ;;  %954 = vmatpush.bf16.msrb.mxu3 %v1615_v42  ;;  %v1603_v42 = vld [vmem:[#allocation10 + $0x8] sm:$0xff] }
  0x53   :  { %1369 = vmatmul.msk.bf16.gmra.mxu1 %vm158_vm0, %v123_v47  ;;  %v1570_v47 = vld [vmem:[#allocation8 + $0x4] sm:$0xf] }
  0x54   :  { %v1381_v49 = vor.u32 %v1570_v47, %v1378_v48 }
  0x55   :  { %903 = vmatpush.bf16.msrb.mxu2 %v1609_v9 }
  0x56   :  { %632 = vmatpush.bf16.msrb.mxu0 %v1381_v49  ;;  %955 = vmatpush.bf16.msrb.mxu3 %v1614_v58 }
  0x59   :  { %904 = vmatpush.bf16.msrb.mxu2 %v1608_v25 }
  0x5d   :  { %905 = vmatpush.bf16.msrb.mxu2 %v1607_v41 }
  0x62   :  { %1362 = vmatmul.msk.bf16.gmra.mxu0 %vm158_vm0, %v124_v56 }
  0x63   :  { %1370 = vmatmul.msk.bf16.gmra.mxu1 %vm158_vm0, %v124_v56  ;;  %v1586_v56 = vld [vmem:[#allocation8 + $0x84] sm:$0xf] }
  0x64   :  { %v1445_v59 = vor.u32 %v1586_v56, %v1442_v57  ;;  %v1606_v57 = vld [vmem:[#allocation10 + $0x20] sm:$0xff] }
  0x65   :  { %906 = vmatpush.bf16.msrb.mxu2 %v1606_v57 }
  0x66   :  { %681 = vmatpush.bf16.msrb.mxu1 %v1445_v59 }
  0x72   :  { %1363 = vmatmul.msk.bf16.gmra.mxu0 %vm158_vm0, %v125_v7 }
  0x73   :  { %1371 = vmatmul.msk.bf16.gmra.mxu1 %vm158_vm0, %v125_v7  ;;  %v1935_v7 = vperm.slane %v132_v4, 0 }
  0x82   :  { %1364 = vmatmul.msk.bf16.gmra.mxu0 %vm158_vm0, %v126_v37 }
  0x83   :  { %1372 = vmatmul.msk.bf16.gmra.mxu1 %vm158_vm0, %v126_v37 }
  0x92   :  { %1365 = vmatmul.msk.bf16.gmra.mxu0 %vm158_vm0, %v127_v3 }
  0x93   :  { %1373 = vmatmul.msk.bf16.gmra.mxu1 %vm158_vm0, %v127_v3 }
  0x9f   :  { %v192_v5 = vpop.f32.mrf.mxu0 }
  0xa0   :  { %v241_v6 = vpop.f32.mrf.mxu1  ;;  %v193_v11 = vadd.f32 %v192_v5, %v1935_v7 }
  0xa1   :  { %v242_v12 = vadd.f32 %v241_v6, %v1937_v8 }
  0xa2   :  { %v281_v17 = vmax.f32 %v193_v11, 0.0  ;;  %v1605_v11 = vld [vmem:[#allocation10 + $0x18] sm:$0xff] }
  0xa3   :  { %v282_v19 = vmax.f32 %v242_v12, 0.0  ;;  %v1613_v12 = vld [vmem:[#allocation10 + $0x58] sm:$0xff]  ;;  %907 = vmatpush.bf16.msrb.mxu2 %v1605_v11 }
  0xa4   :  { %956 = vmatpush.bf16.msrb.mxu3 %v1613_v12 }
  0xa7   :  { %v194_v13 = vpop.f32.mrf.mxu0 }
  0xa8   :  { %v195_v14 = vadd.f32 %v194_v13, %v1935_v7  ;;  %v243_v15 = vpop.f32.mrf.mxu1 }
  0xa9   :  { %v244_v16 = vadd.f32 %v243_v15, %v1937_v8 }
  0xaa   :  { %v283_v18 = vmax.f32 %v195_v14, 0.0 }
  0xab   :  { %v284_v20 = vmax.f32 %v244_v16, 0.0 }
  0xac   :  { %v313_v21 = vpack.c.bf16 %v283_v18, %v281_v17 }
  0xad   :  { %v314_v22 = vpack.c.bf16 %v284_v20, %v282_v19 }
  0xae   :  { %535 = vmatmul.bf16.vlgmr.msra.gmra.mxu2 %v313_v21  ;;  %633 = vmatmul.bf16.vlgmr.msrb.gmra.mxu0 %v313_v21 }
  0xaf   :  { %584 = vmatmul.bf16.vlgmr.msra.gmra.mxu3 %v314_v22  ;;  %682 = vmatmul.bf16.vlgmr.msrb.gmra.mxu1 %v314_v22  ;;  %v197_v23 = vpop.f32.mrf.mxu0 }
  0xb0   :  { %v246_v24 = vpop.f32.mrf.mxu1  ;;  %v198_v27 = vadd.f32 %v197_v23, %v1935_v7 }
  0xb1   :  { %v247_v28 = vadd.f32 %v246_v24, %v1937_v8 }
  0xb2   :  { %v285_v33 = vmax.f32 %v198_v27, 0.0  ;;  %v1604_v27 = vld [vmem:[#allocation10 + $0x10] sm:$0xff] }
  0xb3   :  { %v286_v35 = vmax.f32 %v247_v28, 0.0  ;;  %v1612_v28 = vld [vmem:[#allocation10 + $0x50] sm:$0xff]  ;;  %908 = vmatpush.bf16.msrb.mxu2 %v1604_v27 }
  0xb4   :  { %957 = vmatpush.bf16.msrb.mxu3 %v1612_v28 }
  0xb7   :  { %v199_v29 = vpop.f32.mrf.mxu0  ;;  %909 = vmatpush.bf16.msrb.mxu2 %v1603_v42 }
  0xb8   :  { %v200_v30 = vadd.f32 %v199_v29, %v1935_v7  ;;  %v248_v31 = vpop.f32.mrf.mxu1 }
  0xb9   :  { %v249_v32 = vadd.f32 %v248_v31, %v1937_v8 }
  0xba   :  { %v287_v34 = vmax.f32 %v200_v30, 0.0 }
  0xbb   :  { %v288_v36 = vmax.f32 %v249_v32, 0.0 }
  0xbc   :  { %v315_v37 = vpack.c.bf16 %v287_v34, %v285_v33 }
  0xbd   :  { %v316_v38 = vpack.c.bf16 %v288_v36, %v286_v35 }
  0xbe   :  { %540 = vmatmul.bf16.gmra.mxu2 %v315_v37  ;;  %638 = vmatmul.bf16.gmra.mxu0 %v315_v37 }
  0xbf   :  { %589 = vmatmul.bf16.gmra.mxu3 %v316_v38  ;;  %687 = vmatmul.bf16.gmra.mxu1 %v316_v38  ;;  %v202_v39 = vpop.f32.mrf.mxu0 }
  0xc0   :  { %v251_v40 = vpop.f32.mrf.mxu1  ;;  %v203_v43 = vadd.f32 %v202_v39, %v1935_v7 }
  0xc1   :  { %v252_v44 = vadd.f32 %v251_v40, %v1937_v8 }
  0xc2   :  { %v289_v49 = vmax.f32 %v203_v43, 0.0  ;;  %v1611_v43 = vld [vmem:[#allocation10 + $0x48] sm:$0xff] }
  0xc3   :  { %v290_v51 = vmax.f32 %v252_v44, 0.0  ;;  %958 = vmatpush.bf16.msrb.mxu3 %v1611_v43 }
  0xc7   :  { %v204_v45 = vpop.f32.mrf.mxu0 }
  0xc8   :  { %v205_v46 = vadd.f32 %v204_v45, %v1935_v7  ;;  %v253_v47 = vpop.f32.mrf.mxu1 }
  0xc9   :  { %v254_v48 = vadd.f32 %v253_v47, %v1937_v8 }
  0xca   :  { %v291_v50 = vmax.f32 %v205_v46, 0.0 }
  0xcb   :  { %v292_v52 = vmax.f32 %v254_v48, 0.0 }
  0xcc   :  { %v317_v53 = vpack.c.bf16 %v291_v50, %v289_v49 }
  0xcd   :  { %v318_v54 = vpack.c.bf16 %v292_v52, %v290_v51 }
  0xce   :  { %545 = vmatmul.bf16.gmra.mxu2 %v317_v53  ;;  %643 = vmatmul.bf16.gmra.mxu0 %v317_v53 }
  0xcf   :  { %594 = vmatmul.bf16.gmra.mxu3 %v318_v54  ;;  %692 = vmatmul.bf16.gmra.mxu1 %v318_v54  ;;  %v207_v55 = vpop.f32.mrf.mxu0 }
  0xd0   :  { %v256_v56 = vpop.f32.mrf.mxu1  ;;  %v208_v59 = vadd.f32 %v207_v55, %v1935_v7 }
  0xd1   :  { %v257_v60 = vadd.f32 %v256_v56, %v1937_v8 }
  0xd2   :  { %v293_v1 = vmax.f32 %v208_v59, 0.0 }
  0xd3   :  { %v294_v3 = vmax.f32 %v257_v60, 0.0  ;;  %v1602_v60 = vld [vmem:[#allocation10] sm:$0xff] }
  0xd4   :  { %910 = vmatpush.bf16.msrb.mxu2 %v1602_v60 }
  0xd7   :  { %v209_v61 = vpop.f32.mrf.mxu0 }
  0xd8   :  { %v210_v62 = vadd.f32 %v209_v61, %v1935_v7  ;;  %v258_v63 = vpop.f32.mrf.mxu1 }
  0xd9   :  { %v259_v0 = vadd.f32 %v258_v63, %v1937_v8 }
  0xda   :  { %v295_v2 = vmax.f32 %v210_v62, 0.0 }
  0xdb   :  { %v296_v4 = vmax.f32 %v259_v0, 0.0 }
  0xdc   :  { %v319_v5 = vpack.c.bf16 %v295_v2, %v293_v1  ;;  %v1610_v1 = vld [vmem:[#allocation10 + $0x40] sm:$0xff] }
  0xdd   :  { %v320_v6 = vpack.c.bf16 %v296_v4, %v294_v3  ;;  %959 = vmatpush.bf16.msrb.mxu3 %v1610_v1 }
  0xde   :  { %550 = vmatmul.bf16.gmra.mxu2 %v319_v5  ;;  %648 = vmatmul.bf16.gmra.mxu0 %v319_v5 }
  0xdf   :  { %599 = vmatmul.bf16.gmra.mxu3 %v320_v6  ;;  %697 = vmatmul.bf16.gmra.mxu1 %v320_v6  ;;  %v212_v9 = vpop.f32.mrf.mxu0 }
  0xe0   :  { %v261_v10 = vpop.f32.mrf.mxu1  ;;  %v213_v13 = vadd.f32 %v212_v9, %v1935_v7 }
  0xe1   :  { %v262_v14 = vadd.f32 %v261_v10, %v1937_v8 }
  0xe2   :  { %v297_v19 = vmax.f32 %v213_v13, 0.0 }
  0xe3   :  { %v298_v21 = vmax.f32 %v262_v14, 0.0 }
  0xe7   :  { %v214_v15 = vpop.f32.mrf.mxu0 }
  0xe8   :  { %v215_v16 = vadd.f32 %v214_v15, %v1935_v7  ;;  %v263_v17 = vpop.f32.mrf.mxu1 }
  0xe9   :  { %v264_v18 = vadd.f32 %v263_v17, %v1937_v8 }
  0xea   :  { %v299_v20 = vmax.f32 %v215_v16, 0.0 }
  0xeb   :  { %v300_v22 = vmax.f32 %v264_v18, 0.0 }
  0xec   :  { %v321_v23 = vpack.c.bf16 %v299_v20, %v297_v19 }
  0xed   :  { %v322_v24 = vpack.c.bf16 %v300_v22, %v298_v21 }
  0xee   :  { %555 = vmatmul.bf16.gmra.mxu2 %v321_v23  ;;  %653 = vmatmul.bf16.gmra.mxu0 %v321_v23 }
  0xef   :  { %604 = vmatmul.bf16.gmra.mxu3 %v322_v24  ;;  %702 = vmatmul.bf16.gmra.mxu1 %v322_v24  ;;  %v217_v25 = vpop.f32.mrf.mxu0 }
  0xf0   :  { %v266_v26 = vpop.f32.mrf.mxu1  ;;  %v218_v29 = vadd.f32 %v217_v25, %v1935_v7 }
  0xf1   :  { %v267_v30 = vadd.f32 %v266_v26, %v1937_v8 }
  0xf2   :  { %v301_v35 = vmax.f32 %v218_v29, 0.0 }
  0xf3   :  { %v302_v37 = vmax.f32 %v267_v30, 0.0 }
  0xf7   :  { %v219_v31 = vpop.f32.mrf.mxu0 }
  0xf8   :  { %v220_v32 = vadd.f32 %v219_v31, %v1935_v7  ;;  %v268_v33 = vpop.f32.mrf.mxu1 }
  0xf9   :  { %v269_v34 = vadd.f32 %v268_v33, %v1937_v8 }
  0xfa   :  { %v303_v36 = vmax.f32 %v220_v32, 0.0 }
  0xfb   :  { %v304_v38 = vmax.f32 %v269_v34, 0.0 }
  0xfc   :  { %v323_v39 = vpack.c.bf16 %v303_v36, %v301_v35 }
  0xfd   :  { %v324_v40 = vpack.c.bf16 %v304_v38, %v302_v37 }
  0xfe   :  { %560 = vmatmul.bf16.gmra.mxu2 %v323_v39  ;;  %658 = vmatmul.bf16.gmra.mxu0 %v323_v39 }
  0xff   :  { %609 = vmatmul.bf16.gmra.mxu3 %v324_v40  ;;  %707 = vmatmul.bf16.gmra.mxu1 %v324_v40  ;;  %v222_v41 = vpop.f32.mrf.mxu0 }
 0x100   :  { %v271_v44 = vpop.f32.mrf.mxu1  ;;  %v223_v45 = vadd.f32 %v222_v41, %v1935_v7 }
 0x101   :  { %v272_v46 = vadd.f32 %v271_v44, %v1937_v8 }
 0x102   :  { %v305_v51 = vmax.f32 %v223_v45, 0.0 }
 0x103   :  { %v306_v53 = vmax.f32 %v272_v46, 0.0 }
 0x107   :  { %v224_v47 = vpop.f32.mrf.mxu0 }
 0x108   :  { %v225_v48 = vadd.f32 %v224_v47, %v1935_v7  ;;  %v273_v49 = vpop.f32.mrf.mxu1 }
 0x109   :  { %v274_v50 = vadd.f32 %v273_v49, %v1937_v8 }
 0x10a   :  { %v307_v52 = vmax.f32 %v225_v48, 0.0 }
 0x10b   :  { %v308_v54 = vmax.f32 %v274_v50, 0.0 }
 0x10c   :  { %v325_v55 = vpack.c.bf16 %v307_v52, %v305_v51 }
 0x10d   :  { %v326_v56 = vpack.c.bf16 %v308_v54, %v306_v53 }
 0x10e   :  { %565 = vmatmul.bf16.gmra.mxu2 %v325_v55  ;;  %663 = vmatmul.bf16.gmra.mxu0 %v325_v55 }
 0x10f   :  { %614 = vmatmul.bf16.gmra.mxu3 %v326_v56  ;;  %712 = vmatmul.bf16.gmra.mxu1 %v326_v56  ;;  %v227_v57 = vpop.f32.mrf.mxu0 }
 0x110   :  { %v276_v58 = vpop.f32.mrf.mxu1  ;;  %v228_v59 = vadd.f32 %v227_v57, %v1935_v7 }
 0x111   :  { %v277_v61 = vadd.f32 %v276_v58, %v1937_v8 }
 0x112   :  { %v309_v3 = vmax.f32 %v228_v59, 0.0 }
 0x113   :  { %v310_v5 = vmax.f32 %v277_v61, 0.0 }
 0x117   :  { %v229_v62 = vpop.f32.mrf.mxu0 }
 0x118   :  { %v230_v63 = vadd.f32 %v229_v62, %v1935_v7  ;;  %v278_v0 = vpop.f32.mrf.mxu1  ;;  %v361_v7 = vld [vmem:[%s2041_s4] sm:$0x3] }
 0x119   :  { %v279_v2 = vadd.f32 %v278_v0, %v1937_v8  ;;  %v1974_v12 = vperm.slane %v361_v7, 1  ;;  %v1977_v15 = vperm.slane %v361_v7, 0 }
 0x11a   :  { %v311_v4 = vmax.f32 %v230_v63, 0.0 }
 0x11b   :  { %v312_v6 = vmax.f32 %v279_v2, 0.0 }
 0x11c   :  { %v327_v9 = vpack.c.bf16 %v311_v4, %v309_v3 }
 0x11d   :  { %v328_v10 = vpack.c.bf16 %v312_v6, %v310_v5 }
 0x11e   :  { %570 = vmatmul.bf16.gmra.mxu2 %v327_v9  ;;  %668 = vmatmul.bf16.gmra.mxu0 %v327_v9 }
 0x11f   :  { %619 = vmatmul.bf16.gmra.mxu3 %v328_v10  ;;  %717 = vmatmul.bf16.gmra.mxu1 %v328_v10 }
 0x12b   :  { %v634_v11 = vpop.f32.mrf.mxu0 }
 0x12c   :  { %v683_v13 = vpop.f32.mrf.mxu1  ;;  %v635_v8 = vadd.f32 %v634_v11, %v1974_v12 }
 0x12e   :  { %v684_v18 = vadd.f32 %v683_v13, %v635_v8 }
 0x130   :  { %v724_v23 = vmax.f32 %v684_v18, 0.0 }
 0x131   :  { %v536_v14 = vpop.f32.mrf.mxu2 }
 0x132   :  { %v585_v16 = vpop.f32.mrf.mxu3  ;;  %v537_v21 = vadd.f32 %v536_v14, %v1977_v15 }
 0x133   :  { %v636_v17 = vpop.f32.mrf.mxu0 }
 0x134   :  { %v637_v19 = vadd.f32 %v636_v17, %v1974_v12  ;;  %v685_v20 = vpop.f32.mrf.mxu1  ;;  %v586_v26 = vadd.f32 %v585_v16, %v537_v21 }
 0x136   :  { %v686_v22 = vadd.f32 %v685_v20, %v637_v19  ;;  %v723_v33 = vmax.f32 %v586_v26, 0.0 }
 0x138   :  { %v726_v24 = vmax.f32 %v686_v22, 0.0 }
 0x139   :  { %v538_v25 = vpop.f32.mrf.mxu2 }
 0x13a   :  { %v756_v27 = vpack.c.bf16 %v726_v24, %v724_v23  ;;  %v539_v28 = vadd.f32 %v538_v25, %v1977_v15  ;;  %v587_v29 = vpop.f32.mrf.mxu3 }
 0x13b   :  { %v639_v30 = vpop.f32.mrf.mxu0 }
 0x13c   :  { %v588_v31 = vadd.f32 %v587_v29, %v539_v28  ;;  %v688_v32 = vpop.f32.mrf.mxu1  ;;  %960 = vmatmul.bf16.vlgmr.msrb.gmra.mxu3 %v756_v27  ;;  %v640_v35 = vadd.f32 %v639_v30, %v1974_v12 }
 0x13e   :  { %v725_v34 = vmax.f32 %v588_v31, 0.0  ;;  %v689_v40 = vadd.f32 %v688_v32, %v640_v35 }
 0x140   :  { %v755_v36 = vpack.c.bf16 %v725_v34, %v723_v33  ;;  %v728_v45 = vmax.f32 %v689_v40, 0.0 }
 0x141   :  { %v541_v37 = vpop.f32.mrf.mxu2 }
 0x142   :  { %v590_v38 = vpop.f32.mrf.mxu3  ;;  %911 = vmatmul.bf16.vlgmr.msrb.gmra.mxu2 %v755_v36  ;;  %v542_v43 = vadd.f32 %v541_v37, %v1977_v15 }
 0x143   :  { %v641_v39 = vpop.f32.mrf.mxu0 }
 0x144   :  { %v642_v41 = vadd.f32 %v641_v39, %v1974_v12  ;;  %v690_v42 = vpop.f32.mrf.mxu1  ;;  %v591_v48 = vadd.f32 %v590_v38, %v542_v43 }
 0x146   :  { %v691_v44 = vadd.f32 %v690_v42, %v642_v41  ;;  %v727_v55 = vmax.f32 %v591_v48, 0.0 }
 0x148   :  { %v730_v46 = vmax.f32 %v691_v44, 0.0 }
 0x149   :  { %v543_v47 = vpop.f32.mrf.mxu2 }
 0x14a   :  { %v544_v49 = vadd.f32 %v543_v47, %v1977_v15  ;;  %v592_v50 = vpop.f32.mrf.mxu3  ;;  %v758_v51 = vpack.c.bf16 %v730_v46, %v728_v45 }
 0x14b   :  { %v644_v52 = vpop.f32.mrf.mxu0 }
 0x14c   :  { %v593_v53 = vadd.f32 %v592_v50, %v544_v49  ;;  %v693_v54 = vpop.f32.mrf.mxu1  ;;  %965 = vmatmul.bf16.gmra.mxu3 %v758_v51  ;;  %v645_v57 = vadd.f32 %v644_v52, %v1974_v12 }
 0x14e   :  { %v729_v56 = vmax.f32 %v593_v53, 0.0  ;;  %v694_v62 = vadd.f32 %v693_v54, %v645_v57 }
 0x150   :  { %v757_v58 = vpack.c.bf16 %v729_v56, %v727_v55  ;;  %v732_v3 = vmax.f32 %v694_v62, 0.0 }
 0x151   :  { %v546_v59 = vpop.f32.mrf.mxu2 }
 0x152   :  { %v595_v60 = vpop.f32.mrf.mxu3  ;;  %916 = vmatmul.bf16.gmra.mxu2 %v757_v58  ;;  %v547_v1 = vadd.f32 %v546_v59, %v1977_v15 }
 0x153   :  { %v646_v61 = vpop.f32.mrf.mxu0 }
 0x154   :  { %v647_v63 = vadd.f32 %v646_v61, %v1974_v12  ;;  %v695_v0 = vpop.f32.mrf.mxu1  ;;  %v596_v6 = vadd.f32 %v595_v60, %v547_v1 }
 0x156   :  { %v696_v2 = vadd.f32 %v695_v0, %v647_v63  ;;  %v731_v14 = vmax.f32 %v596_v6, 0.0 }
 0x158   :  { %v734_v4 = vmax.f32 %v696_v2, 0.0 }
 0x159   :  { %v548_v5 = vpop.f32.mrf.mxu2 }
 0x15a   :  { %v549_v9 = vadd.f32 %v548_v5, %v1977_v15  ;;  %v597_v10 = vpop.f32.mrf.mxu3  ;;  %v760_v7 = vpack.c.bf16 %v734_v4, %v732_v3 }
 0x15b   :  { %v649_v11 = vpop.f32.mrf.mxu0 }
 0x15c   :  { %v598_v13 = vadd.f32 %v597_v10, %v549_v9  ;;  %v698_v8 = vpop.f32.mrf.mxu1  ;;  %970 = vmatmul.bf16.gmra.mxu3 %v760_v7  ;;  %v650_v17 = vadd.f32 %v649_v11, %v1974_v12 }
 0x15e   :  { %v733_v16 = vmax.f32 %v598_v13, 0.0  ;;  %v699_v22 = vadd.f32 %v698_v8, %v650_v17 }
 0x160   :  { %v759_v18 = vpack.c.bf16 %v733_v16, %v731_v14  ;;  %v736_v27 = vmax.f32 %v699_v22, 0.0 }
 0x161   :  { %v551_v19 = vpop.f32.mrf.mxu2 }
 0x162   :  { %v600_v20 = vpop.f32.mrf.mxu3  ;;  %921 = vmatmul.bf16.gmra.mxu2 %v759_v18  ;;  %v552_v25 = vadd.f32 %v551_v19, %v1977_v15 }
 0x163   :  { %v651_v21 = vpop.f32.mrf.mxu0 }
 0x164   :  { %v652_v23 = vadd.f32 %v651_v21, %v1974_v12  ;;  %v700_v24 = vpop.f32.mrf.mxu1  ;;  %v601_v30 = vadd.f32 %v600_v20, %v552_v25 }
 0x166   :  { %v701_v26 = vadd.f32 %v700_v24, %v652_v23  ;;  %v735_v37 = vmax.f32 %v601_v30, 0.0 }
 0x168   :  { %v738_v28 = vmax.f32 %v701_v26, 0.0 }
 0x169   :  { %v553_v29 = vpop.f32.mrf.mxu2 }
 0x16a   :  { %v554_v31 = vadd.f32 %v553_v29, %v1977_v15  ;;  %v602_v32 = vpop.f32.mrf.mxu3  ;;  %v762_v33 = vpack.c.bf16 %v738_v28, %v736_v27 }
 0x16b   :  { %v654_v34 = vpop.f32.mrf.mxu0 }
 0x16c   :  { %v603_v35 = vadd.f32 %v602_v32, %v554_v31  ;;  %v703_v36 = vpop.f32.mrf.mxu1  ;;  %975 = vmatmul.bf16.gmra.mxu3 %v762_v33  ;;  %v655_v39 = vadd.f32 %v654_v34, %v1974_v12 }
 0x16e   :  { %v737_v38 = vmax.f32 %v603_v35, 0.0  ;;  %v704_v44 = vadd.f32 %v703_v36, %v655_v39 }
 0x170   :  { %v761_v40 = vpack.c.bf16 %v737_v38, %v735_v37  ;;  %v740_v49 = vmax.f32 %v704_v44, 0.0 }
 0x171   :  { %v556_v41 = vpop.f32.mrf.mxu2 }
 0x172   :  { %v605_v42 = vpop.f32.mrf.mxu3  ;;  %926 = vmatmul.bf16.gmra.mxu2 %v761_v40  ;;  %v557_v47 = vadd.f32 %v556_v41, %v1977_v15 }
 0x173   :  { %v656_v43 = vpop.f32.mrf.mxu0 }
 0x174   :  { %v657_v45 = vadd.f32 %v656_v43, %v1974_v12  ;;  %v705_v46 = vpop.f32.mrf.mxu1  ;;  %v606_v52 = vadd.f32 %v605_v42, %v557_v47 }
 0x176   :  { %v706_v48 = vadd.f32 %v705_v46, %v657_v45  ;;  %v739_v59 = vmax.f32 %v606_v52, 0.0 }
 0x178   :  { %v742_v50 = vmax.f32 %v706_v48, 0.0 }
 0x179   :  { %v558_v51 = vpop.f32.mrf.mxu2 }
 0x17a   :  { %v764_v53 = vpack.c.bf16 %v742_v50, %v740_v49  ;;  %v559_v54 = vadd.f32 %v558_v51, %v1977_v15  ;;  %v607_v55 = vpop.f32.mrf.mxu3 }
 0x17b   :  { %v659_v56 = vpop.f32.mrf.mxu0 }
 0x17c   :  { %v608_v57 = vadd.f32 %v607_v55, %v559_v54  ;;  %v708_v58 = vpop.f32.mrf.mxu1  ;;  %980 = vmatmul.bf16.gmra.mxu3 %v764_v53  ;;  %v660_v62 = vadd.f32 %v659_v56, %v1974_v12 }
 0x17e   :  { %v741_v60 = vmax.f32 %v608_v57, 0.0  ;;  %v709_v2 = vadd.f32 %v708_v58, %v660_v62 }
 0x180   :  { %v763_v61 = vpack.c.bf16 %v741_v60, %v739_v59  ;;  %v744_v9 = vmax.f32 %v709_v2, 0.0 }
 0x181   :  { %v561_v63 = vpop.f32.mrf.mxu2 }
 0x182   :  { %v610_v0 = vpop.f32.mrf.mxu3  ;;  %931 = vmatmul.bf16.gmra.mxu2 %v763_v61  ;;  %v562_v5 = vadd.f32 %v561_v63, %v1977_v15 }
 0x183   :  { %v661_v1 = vpop.f32.mrf.mxu0 }
 0x184   :  { %v662_v3 = vadd.f32 %v661_v1, %v1974_v12  ;;  %v710_v4 = vpop.f32.mrf.mxu1  ;;  %v611_v11 = vadd.f32 %v610_v0, %v562_v5 }
 0x186   :  { %v711_v6 = vadd.f32 %v710_v4, %v662_v3  ;;  %v743_v19 = vmax.f32 %v611_v11, 0.0 }
 0x188   :  { %v746_v10 = vmax.f32 %v711_v6, 0.0 }
 0x189   :  { %v563_v7 = vpop.f32.mrf.mxu2 }
 0x18a   :  { %v766_v13 = vpack.c.bf16 %v746_v10, %v744_v9  ;;  %v564_v8 = vadd.f32 %v563_v7, %v1977_v15  ;;  %v612_v14 = vpop.f32.mrf.mxu3 }
 0x18b   :  { %v664_v16 = vpop.f32.mrf.mxu0 }
 0x18c   :  { %v613_v17 = vadd.f32 %v612_v14, %v564_v8  ;;  %v713_v18 = vpop.f32.mrf.mxu1  ;;  %985 = vmatmul.bf16.gmra.mxu3 %v766_v13  ;;  %v665_v22 = vadd.f32 %v664_v16, %v1974_v12 }
 0x18e   :  { %v745_v20 = vmax.f32 %v613_v17, 0.0  ;;  %v714_v26 = vadd.f32 %v713_v18, %v665_v22 }
 0x190   :  { %v765_v21 = vpack.c.bf16 %v745_v20, %v743_v19  ;;  %v748_v31 = vmax.f32 %v714_v26, 0.0 }
 0x191   :  { %v566_v23 = vpop.f32.mrf.mxu2 }
 0x192   :  { %v615_v24 = vpop.f32.mrf.mxu3  ;;  %936 = vmatmul.bf16.gmra.mxu2 %v765_v21  ;;  %v567_v29 = vadd.f32 %v566_v23, %v1977_v15 }
 0x193   :  { %v666_v25 = vpop.f32.mrf.mxu0 }
 0x194   :  { %v667_v27 = vadd.f32 %v666_v25, %v1974_v12  ;;  %v715_v28 = vpop.f32.mrf.mxu1  ;;  %v616_v34 = vadd.f32 %v615_v24, %v567_v29 }
 0x196   :  { %v716_v30 = vadd.f32 %v715_v28, %v667_v27  ;;  %v747_v41 = vmax.f32 %v616_v34, 0.0 }
 0x198   :  { %v750_v32 = vmax.f32 %v716_v30, 0.0 }
 0x199   :  { %v568_v33 = vpop.f32.mrf.mxu2 }
 0x19a   :  { %v768_v35 = vpack.c.bf16 %v750_v32, %v748_v31  ;;  %v569_v36 = vadd.f32 %v568_v33, %v1977_v15  ;;  %v617_v37 = vpop.f32.mrf.mxu3 }
 0x19b   :  { %v669_v38 = vpop.f32.mrf.mxu0 }
 0x19c   :  { %v618_v39 = vadd.f32 %v617_v37, %v569_v36  ;;  %v718_v40 = vpop.f32.mrf.mxu1  ;;  %990 = vmatmul.bf16.gmra.mxu3 %v768_v35  ;;  %v670_v44 = vadd.f32 %v669_v38, %v1974_v12 }
 0x19e   :  { %v749_v42 = vmax.f32 %v618_v39, 0.0  ;;  %v719_v48 = vadd.f32 %v718_v40, %v670_v44 }
 0x1a0   :  { %v767_v43 = vpack.c.bf16 %v749_v42, %v747_v41  ;;  %v752_v53 = vmax.f32 %v719_v48, 0.0 }
 0x1a1   :  { %v571_v45 = vpop.f32.mrf.mxu2 }
 0x1a2   :  { %v620_v46 = vpop.f32.mrf.mxu3  ;;  %941 = vmatmul.bf16.gmra.mxu2 %v767_v43  ;;  %v572_v51 = vadd.f32 %v571_v45, %v1977_v15 }
 0x1a3   :  { %v671_v47 = vpop.f32.mrf.mxu0 }
 0x1a4   :  { %v672_v49 = vadd.f32 %v671_v47, %v1974_v12  ;;  %v720_v50 = vpop.f32.mrf.mxu1  ;;  %v621_v56 = vadd.f32 %v620_v46, %v572_v51  ;;  %v2013_v12 = vld [vmem:[%s2043_s6] ss:$0 sm:$0xff] }
 0x1a6   :  { %v721_v52 = vadd.f32 %v720_v50, %v672_v49  ;;  %v751_v61 = vmax.f32 %v621_v56, 0.0 }
 0x1a8   :  { %v754_v54 = vmax.f32 %v721_v52, 0.0 }
 0x1a9   :  { %v573_v55 = vpop.f32.mrf.mxu2 }
 0x1aa   :  { %v770_v57 = vpack.c.bf16 %v754_v54, %v752_v53  ;;  %v574_v58 = vadd.f32 %v573_v55, %v1977_v15  ;;  %v622_v59 = vpop.f32.mrf.mxu3 }
 0x1ac   :  { %v623_v60 = vadd.f32 %v622_v59, %v574_v58  ;;  %995 = vmatmul.bf16.gmra.mxu3 %v770_v57 }
 0x1ae   :  { %v753_v62 = vmax.f32 %v623_v60, 0.0 }
 0x1b0   :  { %v769_v63 = vpack.c.bf16 %v753_v62, %v751_v61 }
 0x1b2   :  { %946 = vmatmul.bf16.gmra.mxu2 %v769_v63 }
 0x1bf   :  { %v961_v0 = vpop.f32.mrf.mxu3 }
 0x1c5   :  { %v912_v1 = vpop.f32.mrf.mxu2 }
 0x1c6   :  { %v913_v2 = vadd.f32 %v2013_v12, %v912_v1 }
 0x1c7   :  { %v963_v3 = vpop.f32.mrf.mxu3 }
 0x1c8   :  { %v962_v4 = vadd.f32 %v961_v0, %v913_v2 }
 0x1ca   :  { %v1001_v5 = vsub.f32 0.0, %v962_v4 }
 0x1cc   :  { %v1017_v15 = vmul.f32 1.442695, %v1001_v5 }
 0x1cd   :  { %v914_v6 = vpop.f32.mrf.mxu2 }
 0x1ce   :  { %1629 = vpow2.f32 %v1017_v15  ;;  %v915_v9 = vadd.f32 %v2013_v12, %v914_v6 }
 0x1cf   :  { %v966_v10 = vpop.f32.mrf.mxu3 }
 0x1d0   :  { %v964_v7 = vadd.f32 %v963_v3, %v915_v9 }
 0x1d2   :  { %v1002_v11 = vsub.f32 0.0, %v964_v7 }
 0x1d4   :  { %v1630_v13 = vpop.eup %1629  ;;  %v1019_v8 = vmul.f32 1.442695, %v1002_v11 }
 0x1d5   :  { %v1049_v14 = vadd.f32 1.0, %v1630_v13  ;;  %v917_v16 = vpop.f32.mrf.mxu2 }
 0x1d6   :  { %1631 = vpow2.f32 %v1019_v8  ;;  %v918_v17 = vadd.f32 %v2013_v12, %v917_v16 }
 0x1d7   :  { %1633 = vrcp.f32 %v1049_v14  ;;  %v968_v18 = vpop.f32.mrf.mxu3  ;;  %v1076_v31 = vand.u32 2147483648, %v1049_v14  ;;  %v1074_v33 = vand.u32 2147483647, %v1049_v14  ;;  %vm1070_vm2 = vweird.f32 %v1049_v14 }
 0x1d8   :  { %v967_v19 = vadd.f32 %v966_v10, %v918_v17 }
 0x1d9   :  { %v1077_v39 = vor.u32 1.1754944e-38, %v1076_v31  ;;  %vm1075_vm4 = vcmp.eq.f32.partialorder %v1074_v33, 8.507059e+37 }
 0x1da   :  { %v1003_v20 = vsub.f32 0.0, %v967_v19 }
 0x1dc   :  { %v1632_v21 = vpop.eup %1631  ;;  %v1021_v22 = vmul.f32 1.442695, %v1003_v20 }
 0x1dd   :  { %v1634_v23 = vpop.eup %1633  ;;  %v1050_v24 = vadd.f32 1.0, %v1632_v21  ;;  %v919_v25 = vpop.f32.mrf.mxu2 }
 0x1de   :  { %v1066_v26 = vmul.f32 %v1634_v23, %v1049_v14  ;;  %1635 = vpow2.f32 %v1021_v22  ;;  %v920_v27 = vadd.f32 %v2013_v12, %v919_v25  ;;  %vm1071_vm1 = vweird.f32 %v1634_v23 }
 0x1df   :  { %1637 = vrcp.f32 %v1050_v24  ;;  %v971_v28 = vpop.f32.mrf.mxu3  ;;  %vm1072_vm3 = vmor %vm1070_vm2, %vm1071_vm1  ;;  %v1091_v48 = vand.u32 2147483648, %v1050_v24  ;;  %v1089_v50 = vand.u32 2147483647, %v1050_v24  ;;  %vm1085_vm6 = vweird.f32 %v1050_v24 }
 0x1e0   :  { %v1067_v29 = vsub.f32 1.0, %v1066_v26  ;;  %v969_v30 = vadd.f32 %v968_v18, %v920_v27 }
 0x1e1   :  { %v1092_v56 = vor.u32 1.1754944e-38, %v1091_v48  ;;  %vm1090_vm8 = vcmp.eq.f32.partialorder %v1089_v50, 8.507059e+37 }
 0x1e2   :  { %v1068_v32 = vmul.f32 %v1634_v23, %v1067_v29  ;;  %v1004_v34 = vsub.f32 0.0, %v969_v30 }
 0x1e4   :  { %v1636_v35 = vpop.eup %1635  ;;  %v1069_v36 = vadd.f32 %v1634_v23, %v1068_v32  ;;  %v1023_v37 = vmul.f32 1.442695, %v1004_v34 }
 0x1e5   :  { %v1638_v38 = vpop.eup %1637  ;;  %v1051_v40 = vadd.f32 1.0, %v1636_v35  ;;  %v922_v41 = vpop.f32.mrf.mxu2 }
 0x1e6   :  { %v1073_v42 = vsel %vm1072_vm3, %v1634_v23, %v1069_v36  ;;  %v1081_v43 = vmul.f32 %v1638_v38, %v1050_v24  ;;  %1639 = vpow2.f32 %v1023_v37  ;;  %v923_v47 = vadd.f32 %v2013_v12, %v922_v41 }
 0x1e7   :  { %v1078_v44 = vsel %vm1075_vm4, %v1077_v39, %v1073_v42  ;;  %1641 = vrcp.f32 %v1051_v40  ;;  %v973_v45 = vpop.f32.mrf.mxu3  ;;  %vm1086_vm5 = vweird.f32 %v1638_v38  ;;  %v1106_v2 = vand.u32 2147483648, %v1051_v40 }
 0x1e8   :  { %1305 = vst [vmem:[#allocation11] sm:$0xff] %v1078_v44  ;;  %v1082_v46 = vsub.f32 1.0, %v1081_v43  ;;  %v972_v51 = vadd.f32 %v971_v28, %v923_v47  ;;  %vm1087_vm7 = vmor %vm1085_vm6, %vm1086_vm5  ;;  %v1104_v4 = vand.u32 2147483647, %v1051_v40  ;;  %vm1100_vm10 = vweird.f32 %v1051_v40 }
 0x1e9   :  { %v1107_v10 = vor.u32 1.1754944e-38, %v1106_v2 }
 0x1ea   :  { %v1083_v49 = vmul.f32 %v1638_v38, %v1082_v46  ;;  %v1005_v54 = vsub.f32 0.0, %v972_v51  ;;  %vm1105_vm12 = vcmp.eq.f32.partialorder %v1104_v4, 8.507059e+37 }
 0x1ec   :  { %v1640_v52 = vpop.eup %1639  ;;  %v1084_v53 = vadd.f32 %v1638_v38, %v1083_v49  ;;  %v1025_v61 = vmul.f32 1.442695, %v1005_v54 }
 0x1ed   :  { %v1642_v55 = vpop.eup %1641  ;;  %v1052_v57 = vadd.f32 1.0, %v1640_v52  ;;  %v924_v58 = vpop.f32.mrf.mxu2 }
 0x1ee   :  { %v1088_v59 = vsel %vm1087_vm7, %v1638_v38, %v1084_v53  ;;  %v1096_v60 = vmul.f32 %v1642_v55, %v1051_v40  ;;  %v925_v1 = vadd.f32 %v2013_v12, %v924_v58  ;;  %vm1101_vm9 = vweird.f32 %v1642_v55 }
 0x1ef   :  { %v1093_v62 = vsel %vm1090_vm8, %v1092_v56, %v1088_v59  ;;  %1643 = vrcp.f32 %v1052_v57  ;;  %v976_v63 = vpop.f32.mrf.mxu3  ;;  %vm1102_vm11 = vmor %vm1100_vm10, %vm1101_vm9  ;;  %v1121_v21 = vand.u32 2147483648, %v1052_v57  ;;  %v1119_v23 = vand.u32 2147483647, %v1052_v57 }
 0x1f0   :  { %1306 = vst [vmem:[#allocation11 + $0x8] sm:$0xff] %v1093_v62  ;;  %v1097_v0 = vsub.f32 1.0, %v1096_v60  ;;  %1645 = vpow2.f32 %v1025_v61  ;;  %v974_v5 = vadd.f32 %v973_v45, %v925_v1  ;;  %vm1115_vm14 = vweird.f32 %v1052_v57 }
 0x1f1   :  { %v1122_v27 = vor.u32 1.1754944e-38, %v1121_v21  ;;  %vm1120_vm0 = vcmp.eq.f32.partialorder %v1119_v23, 8.507059e+37 }
 0x1f2   :  { %v1098_v3 = vmul.f32 %v1642_v55, %v1097_v0  ;;  %v1006_v6 = vsub.f32 0.0, %v974_v5 }
 0x1f4   :  { %v1099_v15 = vadd.f32 %v1642_v55, %v1098_v3  ;;  %v1027_v14 = vmul.f32 1.442695, %v1006_v6 }
 0x1f5   :  { %v1644_v9 = vpop.eup %1643  ;;  %v927_v7 = vpop.f32.mrf.mxu2 }
 0x1f6   :  { %v1646_v11 = vpop.eup %1645  ;;  %v1103_v13 = vsel %vm1102_vm11, %v1642_v55, %v1099_v15  ;;  %v1111_v8 = vmul.f32 %v1644_v9, %v1052_v57  ;;  %v928_v18 = vadd.f32 %v2013_v12, %v927_v7  ;;  %1647 = vpow2.f32 %v1027_v14 }
 0x1f7   :  { %v1108_v16 = vsel %vm1105_vm12, %v1107_v10, %v1103_v13  ;;  %v1053_v17 = vadd.f32 1.0, %v1646_v11  ;;  %v978_v19 = vpop.f32.mrf.mxu3  ;;  %vm1116_vm13 = vweird.f32 %v1644_v9 }
 0x1f8   :  { %1307 = vst [vmem:[#allocation11 + $0x10] sm:$0xff] %v1108_v16  ;;  %v1112_v20 = vsub.f32 1.0, %v1111_v8  ;;  %v977_v24 = vadd.f32 %v976_v63, %v928_v18  ;;  %vm1117_vm15 = vmor %vm1115_vm14, %vm1116_vm13 }
 0x1f9   :  { %1649 = vrcp.f32 %v1053_v17  ;;  %v1136_v41 = vand.u32 2147483648, %v1053_v17  ;;  %v1134_v43 = vand.u32 2147483647, %v1053_v17  ;;  %vm1130_vm2 = vweird.f32 %v1053_v17 }
 0x1fa   :  { %v1113_v22 = vmul.f32 %v1644_v9, %v1112_v20  ;;  %v1007_v26 = vsub.f32 0.0, %v977_v24 }
 0x1fb   :  { %v1137_v50 = vor.u32 1.1754944e-38, %v1136_v41  ;;  %vm1135_vm4 = vcmp.eq.f32.partialorder %v1134_v43, 8.507059e+37 }
 0x1fc   :  { %v1114_v25 = vadd.f32 %v1644_v9, %v1113_v22  ;;  %v1648_v29 = vpop.eup %1647  ;;  %v1029_v31 = vmul.f32 1.442695, %v1007_v26 }
 0x1fd   :  { %v929_v28 = vpop.f32.mrf.mxu2  ;;  %v1054_v35 = vadd.f32 1.0, %v1648_v29 }
 0x1fe   :  { %v1118_v30 = vsel %vm1117_vm15, %v1644_v9, %v1114_v25  ;;  %v930_v32 = vadd.f32 %v2013_v12, %v929_v28  ;;  %1651 = vpow2.f32 %v1029_v31 }
 0x1ff   :  { %v1650_v33 = vpop.eup %1649  ;;  %v1123_v34 = vsel %vm1120_vm0, %v1122_v27, %v1118_v30  ;;  %v981_v36 = vpop.f32.mrf.mxu3  ;;  %1653 = vrcp.f32 %v1054_v35  ;;  %v1151_v59 = vand.u32 2147483648, %v1054_v35  ;;  %v1149_v62 = vand.u32 2147483647, %v1054_v35 }
 0x200   :  { %1308 = vst [vmem:[#allocation11 + $0x18] sm:$0xff] %v1123_v34  ;;  %v1126_v37 = vmul.f32 %v1650_v33, %v1053_v17  ;;  %v979_v38 = vadd.f32 %v978_v19, %v930_v32  ;;  %vm1131_vm1 = vweird.f32 %v1650_v33  ;;  %vm1145_vm6 = vweird.f32 %v1054_v35 }
 0x201   :  { %vm1132_vm3 = vmor %vm1130_vm2, %vm1131_vm1  ;;  %v1152_v5 = vor.u32 1.1754944e-38, %v1151_v59  ;;  %vm1150_vm8 = vcmp.eq.f32.partialorder %v1149_v62, 8.507059e+37 }
 0x202   :  { %v1127_v39 = vsub.f32 1.0, %v1126_v37  ;;  %v1008_v40 = vsub.f32 0.0, %v979_v38 }
 0x204   :  { %v1128_v42 = vmul.f32 %v1650_v33, %v1127_v39  ;;  %v1031_v44 = vmul.f32 1.442695, %v1008_v40  ;;  %v1652_v46 = vpop.eup %1651 }
 0x205   :  { %v932_v45 = vpop.f32.mrf.mxu2  ;;  %v1654_v49 = vpop.eup %1653  ;;  %v1055_v51 = vadd.f32 1.0, %v1652_v46 }
 0x206   :  { %v1129_v47 = vadd.f32 %v1650_v33, %v1128_v42  ;;  %1655 = vpow2.f32 %v1031_v44  ;;  %v933_v48 = vadd.f32 %v2013_v12, %v932_v45  ;;  %v1141_v54 = vmul.f32 %v1654_v49, %v1054_v35 }
 0x207   :  { %v983_v52 = vpop.f32.mrf.mxu3  ;;  %1657 = vrcp.f32 %v1055_v51  ;;  %vm1146_vm5 = vweird.f32 %v1654_v49  ;;  %v1166_v8 = vand.u32 2147483648, %v1055_v51  ;;  %v1164_v17 = vand.u32 2147483647, %v1055_v51 }
 0x208   :  { %v1133_v53 = vsel %vm1132_vm3, %v1650_v33, %v1129_v47  ;;  %v982_v55 = vadd.f32 %v981_v36, %v933_v48  ;;  %v1142_v57 = vsub.f32 1.0, %v1141_v54  ;;  %vm1147_vm7 = vmor %vm1145_vm6, %vm1146_vm5  ;;  %vm1160_vm10 = vweird.f32 %v1055_v51 }
 0x209   :  { %v1138_v56 = vsel %vm1135_vm4, %v1137_v50, %v1133_v53  ;;  %v1167_v24 = vor.u32 1.1754944e-38, %v1166_v8  ;;  %vm1165_vm12 = vcmp.eq.f32.partialorder %v1164_v17, 8.507059e+37 }
 0x20a   :  { %1309 = vst [vmem:[#allocation11 + $0x20] sm:$0xff] %v1138_v56  ;;  %v1009_v58 = vsub.f32 0.0, %v982_v55  ;;  %v1143_v61 = vmul.f32 %v1654_v49, %v1142_v57 }
 0x20c   :  { %v1656_v60 = vpop.eup %1655  ;;  %v1033_v63 = vmul.f32 1.442695, %v1009_v58  ;;  %v1144_v2 = vadd.f32 %v1654_v49, %v1143_v61 }
 0x20d   :  { %v1056_v0 = vadd.f32 1.0, %v1656_v60  ;;  %v934_v1 = vpop.f32.mrf.mxu2  ;;  %v1658_v4 = vpop.eup %1657 }
 0x20e   :  { %1659 = vpow2.f32 %v1033_v63  ;;  %v935_v3 = vadd.f32 %v2013_v12, %v934_v1  ;;  %v1148_v6 = vsel %vm1147_vm7, %v1654_v49, %v1144_v2  ;;  %v1156_v9 = vmul.f32 %v1658_v4, %v1055_v51 }
 0x20f   :  { %1661 = vrcp.f32 %v1056_v0  ;;  %v986_v15 = vpop.f32.mrf.mxu3  ;;  %v1153_v7 = vsel %vm1150_vm8, %v1152_v5, %v1148_v6  ;;  %vm1161_vm9 = vweird.f32 %v1658_v4  ;;  %v1181_v30 = vand.u32 2147483648, %v1056_v0 }
 0x210   :  { %v984_v10 = vadd.f32 %v983_v52, %v935_v3  ;;  %1310 = vst [vmem:[#allocation11 + $0x28] sm:$0xff] %v1153_v7  ;;  %v1157_v11 = vsub.f32 1.0, %v1156_v9  ;;  %vm1162_vm11 = vmor %vm1160_vm10, %vm1161_vm9  ;;  %v1179_v32 = vand.u32 2147483647, %v1056_v0  ;;  %vm1175_vm14 = vweird.f32 %v1056_v0 }
 0x211   :  { %v1182_v38 = vor.u32 1.1754944e-38, %v1181_v30 }
 0x212   :  { %v1010_v13 = vsub.f32 0.0, %v984_v10  ;;  %v1158_v16 = vmul.f32 %v1658_v4, %v1157_v11  ;;  %vm1180_vm0 = vcmp.eq.f32.partialorder %v1179_v32, 8.507059e+37 }
 0x214   :  { %v1660_v14 = vpop.eup %1659  ;;  %v1035_v18 = vmul.f32 1.442695, %v1010_v13  ;;  %v1159_v22 = vadd.f32 %v1658_v4, %v1158_v16 }
 0x215   :  { %v1662_v19 = vpop.eup %1661  ;;  %v1057_v20 = vadd.f32 1.0, %v1660_v14  ;;  %v937_v21 = vpop.f32.mrf.mxu2 }
 0x216   :  { %v1171_v23 = vmul.f32 %v1662_v19, %v1056_v0  ;;  %1663 = vpow2.f32 %v1035_v18  ;;  %v1163_v26 = vsel %vm1162_vm11, %v1658_v4, %v1159_v22  ;;  %v938_v28 = vadd.f32 %v2013_v12, %v937_v21 }
 0x217   :  { %1665 = vrcp.f32 %v1057_v20  ;;  %v988_v25 = vpop.f32.mrf.mxu3  ;;  %v1168_v29 = vsel %vm1165_vm12, %v1167_v24, %v1163_v26  ;;  %vm1176_vm13 = vweird.f32 %v1662_v19  ;;  %v1196_v47 = vand.u32 2147483648, %v1057_v20 }
 0x218   :  { %v1172_v27 = vsub.f32 1.0, %v1171_v23  ;;  %1311 = vst [vmem:[#allocation11 + $0x30] sm:$0xff] %v1168_v29  ;;  %v987_v33 = vadd.f32 %v986_v15, %v938_v28  ;;  %vm1177_vm15 = vmor %vm1175_vm14, %vm1176_vm13  ;;  %v1194_v50 = vand.u32 2147483647, %v1057_v20  ;;  %vm1190_vm2 = vweird.f32 %v1057_v20 }
 0x219   :  { %v1197_v55 = vor.u32 1.1754944e-38, %v1196_v47 }
 0x21a   :  { %v1173_v31 = vmul.f32 %v1662_v19, %v1172_v27  ;;  %v1011_v36 = vsub.f32 0.0, %v987_v33  ;;  %vm1195_vm4 = vcmp.eq.f32.partialorder %v1194_v50, 8.507059e+37 }
 0x21c   :  { %v1664_v34 = vpop.eup %1663  ;;  %v1174_v35 = vadd.f32 %v1662_v19, %v1173_v31  ;;  %v1037_v43 = vmul.f32 1.442695, %v1011_v36 }
 0x21d   :  { %v1666_v37 = vpop.eup %1665  ;;  %v1058_v39 = vadd.f32 1.0, %v1664_v34  ;;  %v939_v40 = vpop.f32.mrf.mxu2 }
 0x21e   :  { %v1178_v41 = vsel %vm1177_vm15, %v1662_v19, %v1174_v35  ;;  %v1186_v42 = vmul.f32 %v1666_v37, %v1057_v20  ;;  %v940_v46 = vadd.f32 %v2013_v12, %v939_v40  ;;  %vm1191_vm1 = vweird.f32 %v1666_v37 }
 0x21f   :  { %v1183_v44 = vsel %vm1180_vm0, %v1182_v38, %v1178_v41  ;;  %1667 = vrcp.f32 %v1058_v39  ;;  %v991_v48 = vpop.f32.mrf.mxu3  ;;  %vm1192_vm3 = vmor %vm1190_vm2, %vm1191_vm1  ;;  %v1211_v1 = vand.u32 2147483648, %v1058_v39  ;;  %v1209_v3 = vand.u32 2147483647, %v1058_v39 }
 0x220   :  { %1312 = vst [vmem:[#allocation11 + $0x38] sm:$0xff] %v1183_v44  ;;  %v1187_v45 = vsub.f32 1.0, %v1186_v42  ;;  %1669 = vpow2.f32 %v1037_v43  ;;  %v989_v51 = vadd.f32 %v988_v25, %v940_v46  ;;  %vm1205_vm6 = vweird.f32 %v1058_v39 }
 0x221   :  { %v1212_v9 = vor.u32 1.1754944e-38, %v1211_v1  ;;  %vm1210_vm8 = vcmp.eq.f32.partialorder %v1209_v3, 8.507059e+37 }
 0x222   :  { %v1188_v49 = vmul.f32 %v1666_v37, %v1187_v45  ;;  %v1012_v53 = vsub.f32 0.0, %v989_v51 }
 0x224   :  { %v1189_v52 = vadd.f32 %v1666_v37, %v1188_v49  ;;  %v1039_v60 = vmul.f32 1.442695, %v1012_v53 }
 0x225   :  { %v1668_v54 = vpop.eup %1667  ;;  %v942_v56 = vpop.f32.mrf.mxu2 }
 0x226   :  { %v1670_v57 = vpop.eup %1669  ;;  %v1193_v58 = vsel %vm1192_vm3, %v1666_v37, %v1189_v52  ;;  %v1201_v59 = vmul.f32 %v1668_v54, %v1058_v39  ;;  %v943_v63 = vadd.f32 %v2013_v12, %v942_v56  ;;  %1671 = vpow2.f32 %v1039_v60 }
 0x227   :  { %v1198_v61 = vsel %vm1195_vm4, %v1197_v55, %v1193_v58  ;;  %v1059_v62 = vadd.f32 1.0, %v1670_v57  ;;  %vm1206_vm5 = vweird.f32 %v1668_v54  ;;  %v993_v5 = vpop.f32.mrf.mxu3 }
 0x228   :  { %1313 = vst [vmem:[#allocation11 + $0x40] sm:$0xff] %v1198_v61  ;;  %v1202_v0 = vsub.f32 1.0, %v1201_v59  ;;  %v992_v4 = vadd.f32 %v991_v48, %v943_v63  ;;  %vm1207_vm7 = vmor %vm1205_vm6, %vm1206_vm5 }
 0x229   :  { %1673 = vrcp.f32 %v1059_v62  ;;  %v1226_v22 = vand.u32 2147483648, %v1059_v62  ;;  %v1224_v24 = vand.u32 2147483647, %v1059_v62  ;;  %vm1220_vm10 = vweird.f32 %v1059_v62 }
 0x22a   :  { %v1203_v2 = vmul.f32 %v1668_v54, %v1202_v0  ;;  %v1013_v6 = vsub.f32 0.0, %v992_v4 }
 0x22b   :  { %v1227_v32 = vor.u32 1.1754944e-38, %v1226_v22  ;;  %vm1225_vm12 = vcmp.eq.f32.partialorder %v1224_v24, 8.507059e+37 }
 0x22c   :  { %v1204_v15 = vadd.f32 %v1668_v54, %v1203_v2  ;;  %v1672_v7 = vpop.eup %1671  ;;  %v1041_v13 = vmul.f32 1.442695, %v1013_v6 }
 0x22d   :  { %v944_v10 = vpop.f32.mrf.mxu2  ;;  %v1060_v17 = vadd.f32 1.0, %v1672_v7 }
 0x22e   :  { %v1208_v11 = vsel %vm1207_vm7, %v1668_v54, %v1204_v15  ;;  %v945_v8 = vadd.f32 %v2013_v12, %v944_v10  ;;  %1675 = vpow2.f32 %v1041_v13 }
 0x22f   :  { %v1674_v14 = vpop.eup %1673  ;;  %v1213_v16 = vsel %vm1210_vm8, %v1212_v9, %v1208_v11  ;;  %1677 = vrcp.f32 %v1060_v17  ;;  %v996_v26 = vpop.f32.mrf.mxu3  ;;  %v1241_v40 = vand.u32 2147483648, %v1060_v17  ;;  %v1239_v43 = vand.u32 2147483647, %v1060_v17 }
 0x230   :  { %1314 = vst [vmem:[#allocation11 + $0x48] sm:$0xff] %v1213_v16  ;;  %v1216_v18 = vmul.f32 %v1674_v14, %v1059_v62  ;;  %v994_v19 = vadd.f32 %v993_v5, %v945_v8  ;;  %vm1221_vm9 = vweird.f32 %v1674_v14  ;;  %vm1235_vm14 = vweird.f32 %v1060_v17 }
 0x231   :  { %vm1222_vm11 = vmor %vm1220_vm10, %vm1221_vm9  ;;  %v1242_v50 = vor.u32 1.1754944e-38, %v1241_v40  ;;  %vm1240_vm0 = vcmp.eq.f32.partialorder %v1239_v43, 8.507059e+37 }
 0x232   :  { %v1217_v20 = vsub.f32 1.0, %v1216_v18  ;;  %v1014_v21 = vsub.f32 0.0, %v994_v19 }
 0x234   :  { %v1218_v23 = vmul.f32 %v1674_v14, %v1217_v20  ;;  %v1043_v25 = vmul.f32 1.442695, %v1014_v21  ;;  %v1676_v28 = vpop.eup %1675 }
 0x235   :  { %v947_v27 = vpop.f32.mrf.mxu2  ;;  %v1678_v31 = vpop.eup %1677  ;;  %v1061_v33 = vadd.f32 1.0, %v1676_v28 }
 0x236   :  { %v1219_v29 = vadd.f32 %v1674_v14, %v1218_v23  ;;  %1679 = vpow2.f32 %v1043_v25  ;;  %v948_v30 = vadd.f32 %v2013_v12, %v947_v27  ;;  %v1231_v35 = vmul.f32 %v1678_v31, %v1060_v17 }
 0x237   :  { %1681 = vrcp.f32 %v1061_v33  ;;  %vm1236_vm13 = vweird.f32 %v1678_v31  ;;  %v998_v51 = vpop.f32.mrf.mxu3  ;;  %v1256_v58 = vand.u32 2147483648, %v1061_v33  ;;  %v1254_v61 = vand.u32 2147483647, %v1061_v33 }
 0x238   :  { %v1223_v34 = vsel %vm1222_vm11, %v1674_v14, %v1219_v29  ;;  %v997_v36 = vadd.f32 %v996_v26, %v948_v30  ;;  %v1232_v38 = vsub.f32 1.0, %v1231_v35  ;;  %vm1237_vm15 = vmor %vm1235_vm14, %vm1236_vm13  ;;  %vm1250_vm2 = vweird.f32 %v1061_v33 }
 0x239   :  { %v1228_v37 = vsel %vm1225_vm12, %v1227_v32, %v1223_v34  ;;  %v1257_v2 = vor.u32 1.1754944e-38, %v1256_v58  ;;  %vm1255_vm4 = vcmp.eq.f32.partialorder %v1254_v61, 8.507059e+37 }
 0x23a   :  { %1315 = vst [vmem:[#allocation11 + $0x50] sm:$0xff] %v1228_v37  ;;  %v1015_v39 = vsub.f32 0.0, %v997_v36  ;;  %v1233_v42 = vmul.f32 %v1678_v31, %v1232_v38 }
 0x23c   :  { %v1680_v41 = vpop.eup %1679  ;;  %v1045_v44 = vmul.f32 1.442695, %v1015_v39  ;;  %v1234_v47 = vadd.f32 %v1678_v31, %v1233_v42 }
 0x23d   :  { %v1062_v45 = vadd.f32 1.0, %v1680_v41  ;;  %v949_v46 = vpop.f32.mrf.mxu2  ;;  %v1682_v49 = vpop.eup %1681 }
 0x23e   :  { %1683 = vpow2.f32 %v1045_v44  ;;  %v950_v48 = vadd.f32 %v2013_v12, %v949_v46  ;;  %v1238_v52 = vsel %vm1237_vm15, %v1678_v31, %v1234_v47  ;;  %v1246_v53 = vmul.f32 %v1682_v49, %v1061_v33 }
 0x23f   :  { %1685 = vrcp.f32 %v1062_v45  ;;  %v1243_v55 = vsel %vm1240_vm0, %v1242_v50, %v1238_v52  ;;  %vm1251_vm1 = vweird.f32 %v1682_v49  ;;  %v1271_v15 = vand.u32 2147483648, %v1062_v45 }
 0x240   :  { %v999_v54 = vadd.f32 %v998_v51, %v950_v48  ;;  %1316 = vst [vmem:[#allocation11 + $0x58] sm:$0xff] %v1243_v55  ;;  %v1247_v56 = vsub.f32 1.0, %v1246_v53  ;;  %vm1252_vm3 = vmor %vm1250_vm2, %vm1251_vm1  ;;  %v1269_v9 = vand.u32 2147483647, %v1062_v45  ;;  %vm1265_vm6 = vweird.f32 %v1062_v45 }
 0x241   :  { %v1272_v13 = vor.u32 1.1754944e-38, %v1271_v15 }
 0x242   :  { %v1016_v57 = vsub.f32 0.0, %v999_v54  ;;  %v1248_v60 = vmul.f32 %v1682_v49, %v1247_v56  ;;  %vm1270_vm8 = vcmp.eq.f32.partialorder %v1269_v9, 8.507059e+37 }
 0x244   :  { %v1684_v59 = vpop.eup %1683  ;;  %v1047_v62 = vmul.f32 1.442695, %v1016_v57  ;;  %v1249_v0 = vadd.f32 %v1682_v49, %v1248_v60 }
 0x245   :  { %v1686_v12 = vpop.eup %1685  ;;  %v1063_v63 = vadd.f32 1.0, %v1684_v59 }
 0x246   :  { %v1261_v1 = vmul.f32 %v1686_v12, %v1062_v45  ;;  %1687 = vpow2.f32 %v1047_v62  ;;  %v1253_v3 = vsel %vm1252_vm3, %v1682_v49, %v1249_v0  ;;  %vm1266_vm5 = vweird.f32 %v1686_v12 }
 0x247   :  { %1689 = vrcp.f32 %v1063_v63  ;;  %v1258_v5 = vsel %vm1255_vm4, %v1257_v2, %v1253_v3  ;;  %vm1267_vm7 = vmor %vm1265_vm6, %vm1266_vm5  ;;  %v1286_v19 = vand.u32 2147483648, %v1063_v63  ;;  %v1284_v21 = vand.u32 2147483647, %v1063_v63 }
 0x248   :  { %v1262_v4 = vsub.f32 1.0, %v1261_v1  ;;  %1317 = vst [vmem:[#allocation11 + $0x60] sm:$0xff] %v1258_v5  ;;  %vm1280_vm10 = vweird.f32 %v1063_v63 }
 0x249   :  { %v1287_v24 = vor.u32 1.1754944e-38, %v1286_v19  ;;  %vm1285_vm12 = vcmp.eq.f32.partialorder %v1284_v21, 8.507059e+37 }
 0x24a   :  { %v1263_v6 = vmul.f32 %v1686_v12, %v1262_v4 }
 0x24c   :  { %v1688_v10 = vpop.eup %1687  ;;  %v1264_v7 = vadd.f32 %v1686_v12, %v1263_v6 }
 0x24d   :  { %v1690_v11 = vpop.eup %1689  ;;  %v1064_v8 = vadd.f32 1.0, %v1688_v10 }
 0x24e   :  { %v1268_v14 = vsel %vm1267_vm7, %v1686_v12, %v1264_v7  ;;  %v1276_v16 = vmul.f32 %v1690_v11, %v1063_v63  ;;  %vm1281_vm9 = vweird.f32 %v1690_v11 }
 0x24f   :  { %v1273_v17 = vsel %vm1270_vm8, %v1272_v13, %v1268_v14  ;;  %1691 = vrcp.f32 %v1064_v8  ;;  %vm1282_vm11 = vmor %vm1280_vm10, %vm1281_vm9  ;;  %v1301_v29 = vand.u32 2147483648, %v1064_v8  ;;  %v1299_v31 = vand.u32 2147483647, %v1064_v8 }
 0x250   :  { %1318 = vst [vmem:[#allocation11 + $0x68] sm:$0xff] %v1273_v17  ;;  %v1277_v18 = vsub.f32 1.0, %v1276_v16  ;;  %vm1295_vm14 = vweird.f32 %v1064_v8 }
 0x251   :  { %v1302_v33 = vor.u32 1.1754944e-38, %v1301_v29  ;;  %vm1300_vm0 = vcmp.eq.f32.partialorder %v1299_v31, 8.507059e+37 }
 0x252   :  { %v1278_v20 = vmul.f32 %v1690_v11, %v1277_v18 }
 0x254   :  { %v1279_v22 = vadd.f32 %v1690_v11, %v1278_v20 }
 0x255   :  { %v1692_v23 = vpop.eup %1691 }
 0x256   :  { %v1283_v25 = vsel %vm1282_vm11, %v1690_v11, %v1279_v22  ;;  %v1291_v26 = vmul.f32 %v1692_v23, %v1064_v8  ;;  %vm1296_vm13 = vweird.f32 %v1692_v23 }
 0x257   :  { %v1288_v27 = vsel %vm1285_vm12, %v1287_v24, %v1283_v25  ;;  %vm1297_vm15 = vmor %vm1295_vm14, %vm1296_vm13 }
 0x258   :  { %1319 = vst [vmem:[#allocation11 + $0x70] sm:$0xff] %v1288_v27  ;;  %v1292_v28 = vsub.f32 1.0, %v1291_v26 }
 0x25a   :  { %v1293_v30 = vmul.f32 %v1692_v23, %v1292_v28 }
 0x25c   :  { %v1294_v32 = vadd.f32 %v1692_v23, %v1293_v30 }
 0x25e   :  { %v1298_v34 = vsel %vm1297_vm15, %v1692_v23, %v1294_v32 }
 0x25f   :  { %v1303_v35 = vsel %vm1300_vm0, %v1302_v33, %v1298_v34 }
 0x260   :  { %1320 = vst [vmem:[#allocation11 + $0x78] sm:$0xff] %v1303_v35 }
 0x261   :  { %1324 = vsyncadd [#allocation4], 1920  ;;  %s1327_s29 = sshll.u32 %s2044_s7, 4  ;;  %s1854_s30 = smov [#allocation11]   ;;  %s1328_s29 = int_to_ptr.hbm [resolvable:$true] %s1327_s29 }
 0x262   :  { %s1325_s8 = sshll.u32 %s1854_s30, 4  ;;  %s1326_s8 = int_to_ptr.vmem [resolvable:$true] %s1325_s8 }
 0x263   :  { %1333 = dma.vmem_to_hbm [thread:$0]  %s1326_s8, 128, %s1328_s29, [#allocation4], %s1846_s9, %s1846_s9, %s1847_s10  }
 0x264   :  { %1843 = dma.done.wait [#allocation4], 2048  }
 0x265   :  { %1844 = vsyncadd [#allocation4], 4294965248 }
 0x266   :  { %1338 = vsyncpa [#allocation3], 1 }
 0x267   :  { %1339 = vsyncpa [#allocation6], 1 }
 0x268   :  { %1340 = vsyncpa [#allocation9], 1 }
 0x269   :  { %1341 = vsyncpa [#allocation4], 1 }

</bundles_post_ra>
